<compile_context>
chip_gen: v7x
topology: tpu7x:2x2x1
jax: 0.10.0
libtpu: 0.0.40
codegen_flags: <defaults>
</compile_context>

<pallas_src>
import functools

import jax
import jax.numpy as jnp
from jax import lax
from jax.experimental import pallas as pl
from jax.experimental.pallas import tpu as pltpu

INPUT_SIZE = 64
HIDDEN = 128
NUM_CLASSES = 40
BN_EPS = 1e-5
VMEM_LIMIT_BYTES = 32 * 1024 * 1024   # safe scoped-VMEM limit on v5e/v6e/v7x


def _lstm_fused_kernel(x_ref, wih_ref, bg_ref, whh_ref, gamma_ref, beta_ref,
                       wfc_ref, bfc_ref, out_ref, h_ref, c_ref,
                       *, seq_len, chunk, batch):
    """One time-chunk: fused input projection + LSTM recurrence; BN+FC+ReLU on
    the last grid step.

    x_ref:     (chunk*B, 64)   raw input rows, time-major (t, b) flattened
    wih_ref:   (64, 4H)        input->gates weight (pre-transposed), VMEM-resident
    bg_ref:    (1, 4H)         b_ih + b_hh (folded once in the wrapper)
    whh_ref:   (H, 4H)         hidden->gates weight (pre-transposed)
    gamma/beta:(1, H)          BatchNorm affine params
    wfc_ref:   (H, 40)         FC weight (pre-transposed)
    bfc_ref:   (1, 40)         FC bias
    out_ref:   (B, 40)         output (written only on the last grid step)
    h_ref/c_ref: (B, H) VMEM scratch, persistent across grid steps
    """
    H = HIDDEN
    t0 = pl.program_id(0) * chunk
    needs_mask = (seq_len % chunk) != 0

    @pl.when(pl.program_id(0) == 0)
    def _init():
        h_ref[...] = jnp.zeros_like(h_ref)
        c_ref[...] = jnp.zeros_like(c_ref)

    # Fused, hoisted input projection for the whole chunk.  Not on the serial
    # h-dependence path, so it overlaps with the pipeline / recurrence.
    xproj = (jnp.dot(x_ref[...], wih_ref[...],
                     preferred_element_type=jnp.float32)
             + bg_ref[...])                                   # (chunk*B, 4H)

    whh = whh_ref[...]
    h = h_ref[...]
    c = c_ref[...]

    # Statically unrolled over the time chunk: only h @ W_hh and the gate
    # elementwise math sit on the serial critical path.
    for s in range(chunk):
        x_s = xproj[s * batch:(s + 1) * batch, :]             # static slice (B, 4H)
        gates = x_s + jnp.dot(h, whh, preferred_element_type=jnp.float32)
        # PyTorch gate order: i, f, g, o.  i and f share one contiguous EUP pass.
        if_g = jax.nn.sigmoid(gates[:, :2 * H])
        i_g = if_g[:, :H]
        f_g = if_g[:, H:]
        g_g = jnp.tanh(gates[:, 2 * H:3 * H])
        o_g = jax.nn.sigmoid(gates[:, 3 * H:])
        c_new = f_g * c + i_g * g_g
        h_new = o_g * jnp.tanh(c_new)
        if needs_mask:
            # Padded tail timesteps (zero-padded input in the wrapper): freeze state.
            valid = (t0 + s) < seq_len
            h = jnp.where(valid, h_new, h)
            c = jnp.where(valid, c_new, c)
        else:
            h = h_new
            c = c_new

    h_ref[...] = h
    c_ref[...] = c

    @pl.when(pl.program_id(0) == pl.num_programs(0) - 1)
    def _finalize():
        # BatchNorm1d(128), training-mode (biased) batch statistics.
        mean = jnp.mean(h, axis=0, keepdims=True)
        diff = h - mean
        var = jnp.mean(diff * diff, axis=0, keepdims=True)
        h_norm = diff * lax.rsqrt(var + BN_EPS) * gamma_ref[...] + beta_ref[...]
        # Linear(128 -> 40) + ReLU
        y = (jnp.dot(h_norm, wfc_ref[...], preferred_element_type=jnp.float32)
             + bfc_ref[...])
        out_ref[...] = jnp.maximum(y, 0.0)


def model_forward(x_btf, params, *, time_chunk=32):
    """x_btf: (B, T, 64) float32 (batch_first, matching the PyTorch module)."""
    B, T, F = x_btf.shape
    assert F == INPUT_SIZE

    # Time-major flat rows (t, b).  x itself is the only HBM-streamed tensor
    # now (the gate projection never touches HBM), so this small transpose is
    # negligible traffic at these shapes.
    x_tbf = jnp.transpose(x_btf, (1, 0, 2))                  # (T, B, 64)

    # Pick a chunk whose row count is sublane-friendly (multiple of 8 or full).
    if T <= time_chunk:
        tt = T
    else:
        tt = time_chunk
        while (tt * B) % 8 != 0:
            tt += 1
    n_chunks = -(-T // tt)
    t_pad = n_chunks * tt
    if t_pad != T:
        # Zero-pad the time tail so no stale VMEM ever flows through the gates.
        x_tbf = jnp.pad(x_tbf, ((0, t_pad - T), (0, 0), (0, 0)))
    x_flat = x_tbf.reshape(t_pad * B, INPUT_SIZE)            # sublane-dense rows

    kernel = functools.partial(_lstm_fused_kernel,
                               seq_len=T, chunk=tt, batch=B)
    out = pl.pallas_call(
        kernel,
        out_shape=jax.ShapeDtypeStruct((B, NUM_CLASSES), jnp.float32),
        grid=(n_chunks,),
        in_specs=[pl.BlockSpec((tt * B, INPUT_SIZE), lambda t: (t, 0)),
                  pl.BlockSpec((INPUT_SIZE, 4 * HIDDEN), lambda t: (0, 0)),
                  pl.BlockSpec((1, 4 * HIDDEN), lambda t: (0, 0)),
                  pl.BlockSpec((HIDDEN, 4 * HIDDEN), lambda t: (0, 0)),
                  pl.BlockSpec((1, HIDDEN), lambda t: (0, 0)),
                  pl.BlockSpec((1, HIDDEN), lambda t: (0, 0)),
                  pl.BlockSpec((HIDDEN, NUM_CLASSES), lambda t: (0, 0)),
                  pl.BlockSpec((1, NUM_CLASSES), lambda t: (0, 0))],
        out_specs=pl.BlockSpec((B, NUM_CLASSES), lambda t: (0, 0)),
        scratch_shapes=[pltpu.VMEM((B, HIDDEN), jnp.float32),   # h state
                        pltpu.VMEM((B, HIDDEN), jnp.float32)],  # c state
        compiler_params=pltpu.CompilerParams(
            dimension_semantics=("arbitrary",),
            vmem_limit_bytes=VMEM_LIMIT_BYTES),
    )(x_flat, params["w_ih_t"], params["b_gates"], params["w_hh_t"],
      params["bn_gamma"], params["bn_beta"], params["w_fc_t"], params["b_fc"])
    return out


def init_params(key):
    """Deterministic synthetic parameters with PyTorch-default-style init."""
    k = 1.0 / jnp.sqrt(jnp.float32(HIDDEN))
    keys = jax.random.split(key, 6)
    w_ih = jax.random.uniform(keys[0], (4 * HIDDEN, INPUT_SIZE),
                              jnp.float32, -k, k)
    w_hh = jax.random.uniform(keys[1], (4 * HIDDEN, HIDDEN),
                              jnp.float32, -k, k)
    b_ih = jax.random.uniform(keys[2], (4 * HIDDEN,), jnp.float32, -k, k)
    b_hh = jax.random.uniform(keys[3], (4 * HIDDEN,), jnp.float32, -k, k)
    kf = 1.0 / jnp.sqrt(jnp.float32(HIDDEN))
    w_fc = jax.random.uniform(keys[4], (NUM_CLASSES, HIDDEN),
                              jnp.float32, -kf, kf)
    b_fc = jax.random.uniform(keys[5], (NUM_CLASSES,), jnp.float32, -kf, kf)

    return {
        "w_ih_t": jnp.asarray(w_ih.T),                           # (64, 512)
        "w_hh_t": jnp.asarray(w_hh.T),                           # (128, 512)
        "b_gates": (b_ih + b_hh).reshape(1, 4 * HIDDEN),         # (1, 512)
        "bn_gamma": jnp.ones((1, HIDDEN), jnp.float32),          # BN weight
        "bn_beta": jnp.zeros((1, HIDDEN), jnp.float32),          # BN bias
        "w_fc_t": jnp.asarray(w_fc.T),                           # (128, 40)
        "b_fc": b_fc.reshape(1, NUM_CLASSES),                    # (1, 40)
    }


if __name__ == "__main__":
    key = jax.random.PRNGKey(0)
    pkey, xkey = jax.random.split(key)
    params = init_params(pkey)

    B, T = 2, 8
    x = jax.random.normal(xkey, (B, T, INPUT_SIZE), jnp.float32)

    out = model_forward(x, params)
    out = jax.block_until_ready(out)
    assert out.shape == (B, NUM_CLASSES)
    assert bool(jnp.all(out >= 0.0))  # ReLU output
    print("KERNEL_OK")
</pallas_src>

<mosaic_0001>
module attributes {stable_mosaic.version = 11 : i64} {
  func.func @_lstm_fused_kernel(%arg0: i32, %arg1: memref<16x64xf32, #tpu.memory_space<vmem>>, %arg2: memref<64x512xf32, #tpu.memory_space<vmem>>, %arg3: memref<1x512xf32, #tpu.memory_space<vmem>>, %arg4: memref<128x512xf32, #tpu.memory_space<vmem>>, %arg5: memref<1x128xf32, #tpu.memory_space<vmem>>, %arg6: memref<1x128xf32, #tpu.memory_space<vmem>>, %arg7: memref<128x40xf32, #tpu.memory_space<vmem>>, %arg8: memref<1x40xf32, #tpu.memory_space<vmem>>, %arg9: memref<2x40xf32, #tpu.memory_space<vmem>>, %arg10: memref<2x128xf32, #tpu.memory_space<vmem>>, %arg11: memref<2x128xf32, #tpu.memory_space<vmem>>) attributes {dimension_semantics = [#tpu.dimension_semantics<arbitrary>], iteration_bounds = array<i64: 1>, scalar_prefetch = 0 : i64, scratch_operands = 2 : i64, tpu.core_type = #tpu.core_type<tc>, window_params = [{transform_indices = @transform_0, window_bounds = array<i64: 16, 64>}, {pipeline_mode = #tpu.pipeline_mode<synchronous>, transform_indices = @transform_1, window_bounds = array<i64: 64, 512>}, {pipeline_mode = #tpu.pipeline_mode<synchronous>, transform_indices = @transform_2, window_bounds = array<i64: 1, 512>}, {pipeline_mode = #tpu.pipeline_mode<synchronous>, transform_indices = @transform_3, window_bounds = array<i64: 128, 512>}, {pipeline_mode = #tpu.pipeline_mode<synchronous>, transform_indices = @transform_4, window_bounds = array<i64: 1, 128>}, {pipeline_mode = #tpu.pipeline_mode<synchronous>, transform_indices = @transform_5, window_bounds = array<i64: 1, 128>}, {pipeline_mode = #tpu.pipeline_mode<synchronous>, transform_indices = @transform_6, window_bounds = array<i64: 128, 40>}, {pipeline_mode = #tpu.pipeline_mode<synchronous>, transform_indices = @transform_7, window_bounds = array<i64: 1, 40>}, {pipeline_mode = #tpu.pipeline_mode<synchronous>, transform_indices = @transform_8, window_bounds = array<i64: 2, 40>}]} {
    %c0_i32 = arith.constant 0 : i32
    %0 = arith.cmpi eq, %arg0, %c0_i32 : i32
    %1 = arith.extui %0 : i1 to i32
    %c0_i32_0 = arith.constant 0 : i32
    %2 = arith.cmpi ne, %1, %c0_i32_0 : i32
    scf.if %2 {
      %cst_42 = arith.constant 0.000000e+00 : f32
      %209 = vector.broadcast %cst_42 : f32 to vector<2x128xf32>
      %c0_43 = arith.constant 0 : index
      %c0_44 = arith.constant 0 : index
      %210 = vector.load %arg10[%c0_43, %c0_44] : memref<2x128xf32, #tpu.memory_space<vmem>>, vector<2x128xf32>
      tpu.vector_store %arg10[%c0_43, %c0_44], %209 {strides = array<i32>} : memref<2x128xf32, #tpu.memory_space<vmem>>, vector<2x128xf32>,
      %cst_45 = arith.constant 0.000000e+00 : f32
      %211 = vector.broadcast %cst_45 : f32 to vector<2x128xf32>
      %c0_46 = arith.constant 0 : index
      %c0_47 = arith.constant 0 : index
      %212 = vector.load %arg11[%c0_46, %c0_47] : memref<2x128xf32, #tpu.memory_space<vmem>>, vector<2x128xf32>
      tpu.vector_store %arg11[%c0_46, %c0_47], %211 {strides = array<i32>} : memref<2x128xf32, #tpu.memory_space<vmem>>, vector<2x128xf32>,
    } else {
    }
    %c0 = arith.constant 0 : index
    %c0_1 = arith.constant 0 : index
    %3 = vector.load %arg1[%c0, %c0_1] : memref<16x64xf32, #tpu.memory_space<vmem>>, vector<16x64xf32>
    %c0_2 = arith.constant 0 : index
    %c0_3 = arith.constant 0 : index
    %4 = vector.load %arg2[%c0_2, %c0_3] : memref<64x512xf32, #tpu.memory_space<vmem>>, vector<64x512xf32>
    %cst = arith.constant dense<0.000000e+00> : vector<16x512xf32>
    %5 = tpu.matmul %3, %4, %cst {dimension_numbers = #tpu.dot_dimension_numbers<[1], [0], [0], [1], [0, 0, 1, 1], [], []>} : vector<16x64xf32>, vector<64x512xf32>, vector<16x512xf32> -> vector<16x512xf32>
    %c0_4 = arith.constant 0 : index
    %c0_5 = arith.constant 0 : index
    %6 = vector.load %arg3[%c0_4, %c0_5] : memref<1x512xf32, #tpu.memory_space<vmem>>, vector<1x512xf32>
    %7 = vector.broadcast %6 : vector<1x512xf32> to vector<16x512xf32>
    %8 = arith.addf %5, %7 : vector<16x512xf32>
    %c0_6 = arith.constant 0 : index
    %c0_7 = arith.constant 0 : index
    %9 = vector.load %arg4[%c0_6, %c0_7] : memref<128x512xf32, #tpu.memory_space<vmem>>, vector<128x512xf32>
    %c0_8 = arith.constant 0 : index
    %c0_9 = arith.constant 0 : index
    %10 = vector.load %arg10[%c0_8, %c0_9] : memref<2x128xf32, #tpu.memory_space<vmem>>, vector<2x128xf32>
    %c0_10 = arith.constant 0 : index
    %c0_11 = arith.constant 0 : index
    %11 = vector.load %arg11[%c0_10, %c0_11] : memref<2x128xf32, #tpu.memory_space<vmem>>, vector<2x128xf32>
    %12 = vector.extract_strided_slice %8 {offsets = [0, 0], sizes = [2, 512], strides = [1, 1]} : vector<16x512xf32> to vector<2x512xf32>
    %cst_12 = arith.constant dense<0.000000e+00> : vector<2x512xf32>
    %13 = tpu.matmul %10, %9, %cst_12 {dimension_numbers = #tpu.dot_dimension_numbers<[1], [0], [0], [1], [0, 0, 1, 1], [], []>} : vector<2x128xf32>, vector<128x512xf32>, vector<2x512xf32> -> vector<2x512xf32>
    %14 = arith.addf %12, %13 : vector<2x512xf32>
    %15 = vector.extract_strided_slice %14 {offsets = [0, 0], sizes = [2, 256], strides = [1, 1]} : vector<2x512xf32> to vector<2x256xf32>
    %16 = arith.negf %15 : vector<2x256xf32>
    %17 = math.exp %16 : vector<2x256xf32>
    %cst_13 = arith.constant 1.000000e+00 : f32
    %18 = vector.broadcast %cst_13 : f32 to vector<2x256xf32>
    %19 = arith.addf %18, %17 : vector<2x256xf32>
    %20 = arith.divf %18, %19 : vector<2x256xf32>
    %21 = vector.extract_strided_slice %20 {offsets = [0, 0], sizes = [2, 128], strides = [1, 1]} : vector<2x256xf32> to vector<2x128xf32>
    %22 = vector.extract_strided_slice %20 {offsets = [0, 128], sizes = [2, 128], strides = [1, 1]} : vector<2x256xf32> to vector<2x128xf32>
    %23 = vector.extract_strided_slice %14 {offsets = [0, 256], sizes = [2, 128], strides = [1, 1]} : vector<2x512xf32> to vector<2x128xf32>
    %24 = math.tanh %23 : vector<2x128xf32>
    %25 = vector.extract_strided_slice %14 {offsets = [0, 384], sizes = [2, 128], strides = [1, 1]} : vector<2x512xf32> to vector<2x128xf32>
    %26 = arith.negf %25 : vector<2x128xf32>
    %27 = math.exp %26 : vector<2x128xf32>
    %cst_14 = arith.constant 1.000000e+00 : f32
    %28 = vector.broadcast %cst_14 : f32 to vector<2x128xf32>
    %29 = arith.addf %28, %27 : vector<2x128xf32>
    %30 = arith.divf %28, %29 : vector<2x128xf32>
    %31 = arith.mulf %22, %11 : vector<2x128xf32>
    %32 = arith.mulf %21, %24 : vector<2x128xf32>
    %33 = arith.addf %31, %32 : vector<2x128xf32>
    %34 = math.tanh %33 : vector<2x128xf32>
    %35 = arith.mulf %30, %34 : vector<2x128xf32>
    %36 = vector.extract_strided_slice %8 {offsets = [2, 0], sizes = [2, 512], strides = [1, 1]} : vector<16x512xf32> to vector<2x512xf32>
    %cst_15 = arith.constant dense<0.000000e+00> : vector<2x512xf32>
    %37 = tpu.matmul %35, %9, %cst_15 {dimension_numbers = #tpu.dot_dimension_numbers<[1], [0], [0], [1], [0, 0, 1, 1], [], []>} : vector<2x128xf32>, vector<128x512xf32>, vector<2x512xf32> -> vector<2x512xf32>
    %38 = arith.addf %36, %37 : vector<2x512xf32>
    %39 = vector.extract_strided_slice %38 {offsets = [0, 0], sizes = [2, 256], strides = [1, 1]} : vector<2x512xf32> to vector<2x256xf32>
    %40 = arith.negf %39 : vector<2x256xf32>
    %41 = math.exp %40 : vector<2x256xf32>
    %cst_16 = arith.constant 1.000000e+00 : f32
    %42 = vector.broadcast %cst_16 : f32 to vector<2x256xf32>
    %43 = arith.addf %42, %41 : vector<2x256xf32>
    %44 = arith.divf %42, %43 : vector<2x256xf32>
    %45 = vector.extract_strided_slice %44 {offsets = [0, 0], sizes = [2, 128], strides = [1, 1]} : vector<2x256xf32> to vector<2x128xf32>
    %46 = vector.extract_strided_slice %44 {offsets = [0, 128], sizes = [2, 128], strides = [1, 1]} : vector<2x256xf32> to vector<2x128xf32>
    %47 = vector.extract_strided_slice %38 {offsets = [0, 256], sizes = [2, 128], strides = [1, 1]} : vector<2x512xf32> to vector<2x128xf32>
    %48 = math.tanh %47 : vector<2x128xf32>
    %49 = vector.extract_strided_slice %38 {offsets = [0, 384], sizes = [2, 128], strides = [1, 1]} : vector<2x512xf32> to vector<2x128xf32>
    %50 = arith.negf %49 : vector<2x128xf32>
    %51 = math.exp %50 : vector<2x128xf32>
    %cst_17 = arith.constant 1.000000e+00 : f32
    %52 = vector.broadcast %cst_17 : f32 to vector<2x128xf32>
    %53 = arith.addf %52, %51 : vector<2x128xf32>
    %54 = arith.divf %52, %53 : vector<2x128xf32>
    %55 = arith.mulf %46, %33 : vector<2x128xf32>
    %56 = arith.mulf %45, %48 : vector<2x128xf32>
    %57 = arith.addf %55, %56 : vector<2x128xf32>
    %58 = math.tanh %57 : vector<2x128xf32>
    %59 = arith.mulf %54, %58 : vector<2x128xf32>
    %60 = vector.extract_strided_slice %8 {offsets = [4, 0], sizes = [2, 512], strides = [1, 1]} : vector<16x512xf32> to vector<2x512xf32>
    %cst_18 = arith.constant dense<0.000000e+00> : vector<2x512xf32>
    %61 = tpu.matmul %59, %9, %cst_18 {dimension_numbers = #tpu.dot_dimension_numbers<[1], [0], [0], [1], [0, 0, 1, 1], [], []>} : vector<2x128xf32>, vector<128x512xf32>, vector<2x512xf32> -> vector<2x512xf32>
    %62 = arith.addf %60, %61 : vector<2x512xf32>
    %63 = vector.extract_strided_slice %62 {offsets = [0, 0], sizes = [2, 256], strides = [1, 1]} : vector<2x512xf32> to vector<2x256xf32>
    %64 = arith.negf %63 : vector<2x256xf32>
    %65 = math.exp %64 : vector<2x256xf32>
    %cst_19 = arith.constant 1.000000e+00 : f32
    %66 = vector.broadcast %cst_19 : f32 to vector<2x256xf32>
    %67 = arith.addf %66, %65 : vector<2x256xf32>
    %68 = arith.divf %66, %67 : vector<2x256xf32>
    %69 = vector.extract_strided_slice %68 {offsets = [0, 0], sizes = [2, 128], strides = [1, 1]} : vector<2x256xf32> to vector<2x128xf32>
    %70 = vector.extract_strided_slice %68 {offsets = [0, 128], sizes = [2, 128], strides = [1, 1]} : vector<2x256xf32> to vector<2x128xf32>
    %71 = vector.extract_strided_slice %62 {offsets = [0, 256], sizes = [2, 128], strides = [1, 1]} : vector<2x512xf32> to vector<2x128xf32>
    %72 = math.tanh %71 : vector<2x128xf32>
    %73 = vector.extract_strided_slice %62 {offsets = [0, 384], sizes = [2, 128], strides = [1, 1]} : vector<2x512xf32> to vector<2x128xf32>
    %74 = arith.negf %73 : vector<2x128xf32>
    %75 = math.exp %74 : vector<2x128xf32>
    %cst_20 = arith.constant 1.000000e+00 : f32
    %76 = vector.broadcast %cst_20 : f32 to vector<2x128xf32>
    %77 = arith.addf %76, %75 : vector<2x128xf32>
    %78 = arith.divf %76, %77 : vector<2x128xf32>
    %79 = arith.mulf %70, %57 : vector<2x128xf32>
    %80 = arith.mulf %69, %72 : vector<2x128xf32>
    %81 = arith.addf %79, %80 : vector<2x128xf32>
    %82 = math.tanh %81 : vector<2x128xf32>
    %83 = arith.mulf %78, %82 : vector<2x128xf32>
    %84 = vector.extract_strided_slice %8 {offsets = [6, 0], sizes = [2, 512], strides = [1, 1]} : vector<16x512xf32> to vector<2x512xf32>
    %cst_21 = arith.constant dense<0.000000e+00> : vector<2x512xf32>
    %85 = tpu.matmul %83, %9, %cst_21 {dimension_numbers = #tpu.dot_dimension_numbers<[1], [0], [0], [1], [0, 0, 1, 1], [], []>} : vector<2x128xf32>, vector<128x512xf32>, vector<2x512xf32> -> vector<2x512xf32>
    %86 = arith.addf %84, %85 : vector<2x512xf32>
    %87 = vector.extract_strided_slice %86 {offsets = [0, 0], sizes = [2, 256], strides = [1, 1]} : vector<2x512xf32> to vector<2x256xf32>
    %88 = arith.negf %87 : vector<2x256xf32>
    %89 = math.exp %88 : vector<2x256xf32>
    %cst_22 = arith.constant 1.000000e+00 : f32
    %90 = vector.broadcast %cst_22 : f32 to vector<2x256xf32>
    %91 = arith.addf %90, %89 : vector<2x256xf32>
    %92 = arith.divf %90, %91 : vector<2x256xf32>
    %93 = vector.extract_strided_slice %92 {offsets = [0, 0], sizes = [2, 128], strides = [1, 1]} : vector<2x256xf32> to vector<2x128xf32>
    %94 = vector.extract_strided_slice %92 {offsets = [0, 128], sizes = [2, 128], strides = [1, 1]} : vector<2x256xf32> to vector<2x128xf32>
    %95 = vector.extract_strided_slice %86 {offsets = [0, 256], sizes = [2, 128], strides = [1, 1]} : vector<2x512xf32> to vector<2x128xf32>
    %96 = math.tanh %95 : vector<2x128xf32>
    %97 = vector.extract_strided_slice %86 {offsets = [0, 384], sizes = [2, 128], strides = [1, 1]} : vector<2x512xf32> to vector<2x128xf32>
    %98 = arith.negf %97 : vector<2x128xf32>
    %99 = math.exp %98 : vector<2x128xf32>
    %cst_23 = arith.constant 1.000000e+00 : f32
    %100 = vector.broadcast %cst_23 : f32 to vector<2x128xf32>
    %101 = arith.addf %100, %99 : vector<2x128xf32>
    %102 = arith.divf %100, %101 : vector<2x128xf32>
    %103 = arith.mulf %94, %81 : vector<2x128xf32>
    %104 = arith.mulf %93, %96 : vector<2x128xf32>
    %105 = arith.addf %103, %104 : vector<2x128xf32>
    %106 = math.tanh %105 : vector<2x128xf32>
    %107 = arith.mulf %102, %106 : vector<2x128xf32>
    %108 = vector.extract_strided_slice %8 {offsets = [8, 0], sizes = [2, 512], strides = [1, 1]} : vector<16x512xf32> to vector<2x512xf32>
    %cst_24 = arith.constant dense<0.000000e+00> : vector<2x512xf32>
    %109 = tpu.matmul %107, %9, %cst_24 {dimension_numbers = #tpu.dot_dimension_numbers<[1], [0], [0], [1], [0, 0, 1, 1], [], []>} : vector<2x128xf32>, vector<128x512xf32>, vector<2x512xf32> -> vector<2x512xf32>
    %110 = arith.addf %108, %109 : vector<2x512xf32>
    %111 = vector.extract_strided_slice %110 {offsets = [0, 0], sizes = [2, 256], strides = [1, 1]} : vector<2x512xf32> to vector<2x256xf32>
    %112 = arith.negf %111 : vector<2x256xf32>
    %113 = math.exp %112 : vector<2x256xf32>
    %cst_25 = arith.constant 1.000000e+00 : f32
    %114 = vector.broadcast %cst_25 : f32 to vector<2x256xf32>
    %115 = arith.addf %114, %113 : vector<2x256xf32>
    %116 = arith.divf %114, %115 : vector<2x256xf32>
    %117 = vector.extract_strided_slice %116 {offsets = [0, 0], sizes = [2, 128], strides = [1, 1]} : vector<2x256xf32> to vector<2x128xf32>
    %118 = vector.extract_strided_slice %116 {offsets = [0, 128], sizes = [2, 128], strides = [1, 1]} : vector<2x256xf32> to vector<2x128xf32>
    %119 = vector.extract_strided_slice %110 {offsets = [0, 256], sizes = [2, 128], strides = [1, 1]} : vector<2x512xf32> to vector<2x128xf32>
    %120 = math.tanh %119 : vector<2x128xf32>
    %121 = vector.extract_strided_slice %110 {offsets = [0, 384], sizes = [2, 128], strides = [1, 1]} : vector<2x512xf32> to vector<2x128xf32>
    %122 = arith.negf %121 : vector<2x128xf32>
    %123 = math.exp %122 : vector<2x128xf32>
    %cst_26 = arith.constant 1.000000e+00 : f32
    %124 = vector.broadcast %cst_26 : f32 to vector<2x128xf32>
    %125 = arith.addf %124, %123 : vector<2x128xf32>
    %126 = arith.divf %124, %125 : vector<2x128xf32>
    %127 = arith.mulf %118, %105 : vector<2x128xf32>
    %128 = arith.mulf %117, %120 : vector<2x128xf32>
    %129 = arith.addf %127, %128 : vector<2x128xf32>
    %130 = math.tanh %129 : vector<2x128xf32>
    %131 = arith.mulf %126, %130 : vector<2x128xf32>
    %132 = vector.extract_strided_slice %8 {offsets = [10, 0], sizes = [2, 512], strides = [1, 1]} : vector<16x512xf32> to vector<2x512xf32>
    %cst_27 = arith.constant dense<0.000000e+00> : vector<2x512xf32>
    %133 = tpu.matmul %131, %9, %cst_27 {dimension_numbers = #tpu.dot_dimension_numbers<[1], [0], [0], [1], [0, 0, 1, 1], [], []>} : vector<2x128xf32>, vector<128x512xf32>, vector<2x512xf32> -> vector<2x512xf32>
    %134 = arith.addf %132, %133 : vector<2x512xf32>
    %135 = vector.extract_strided_slice %134 {offsets = [0, 0], sizes = [2, 256], strides = [1, 1]} : vector<2x512xf32> to vector<2x256xf32>
    %136 = arith.negf %135 : vector<2x256xf32>
    %137 = math.exp %136 : vector<2x256xf32>
    %cst_28 = arith.constant 1.000000e+00 : f32
    %138 = vector.broadcast %cst_28 : f32 to vector<2x256xf32>
    %139 = arith.addf %138, %137 : vector<2x256xf32>
    %140 = arith.divf %138, %139 : vector<2x256xf32>
    %141 = vector.extract_strided_slice %140 {offsets = [0, 0], sizes = [2, 128], strides = [1, 1]} : vector<2x256xf32> to vector<2x128xf32>
    %142 = vector.extract_strided_slice %140 {offsets = [0, 128], sizes = [2, 128], strides = [1, 1]} : vector<2x256xf32> to vector<2x128xf32>
    %143 = vector.extract_strided_slice %134 {offsets = [0, 256], sizes = [2, 128], strides = [1, 1]} : vector<2x512xf32> to vector<2x128xf32>
    %144 = math.tanh %143 : vector<2x128xf32>
    %145 = vector.extract_strided_slice %134 {offsets = [0, 384], sizes = [2, 128], strides = [1, 1]} : vector<2x512xf32> to vector<2x128xf32>
    %146 = arith.negf %145 : vector<2x128xf32>
    %147 = math.exp %146 : vector<2x128xf32>
    %cst_29 = arith.constant 1.000000e+00 : f32
    %148 = vector.broadcast %cst_29 : f32 to vector<2x128xf32>
    %149 = arith.addf %148, %147 : vector<2x128xf32>
    %150 = arith.divf %148, %149 : vector<2x128xf32>
    %151 = arith.mulf %142, %129 : vector<2x128xf32>
    %152 = arith.mulf %141, %144 : vector<2x128xf32>
    %153 = arith.addf %151, %152 : vector<2x128xf32>
    %154 = math.tanh %153 : vector<2x128xf32>
    %155 = arith.mulf %150, %154 : vector<2x128xf32>
    %156 = vector.extract_strided_slice %8 {offsets = [12, 0], sizes = [2, 512], strides = [1, 1]} : vector<16x512xf32> to vector<2x512xf32>
    %cst_30 = arith.constant dense<0.000000e+00> : vector<2x512xf32>
    %157 = tpu.matmul %155, %9, %cst_30 {dimension_numbers = #tpu.dot_dimension_numbers<[1], [0], [0], [1], [0, 0, 1, 1], [], []>} : vector<2x128xf32>, vector<128x512xf32>, vector<2x512xf32> -> vector<2x512xf32>
    %158 = arith.addf %156, %157 : vector<2x512xf32>
    %159 = vector.extract_strided_slice %158 {offsets = [0, 0], sizes = [2, 256], strides = [1, 1]} : vector<2x512xf32> to vector<2x256xf32>
    %160 = arith.negf %159 : vector<2x256xf32>
    %161 = math.exp %160 : vector<2x256xf32>
    %cst_31 = arith.constant 1.000000e+00 : f32
    %162 = vector.broadcast %cst_31 : f32 to vector<2x256xf32>
    %163 = arith.addf %162, %161 : vector<2x256xf32>
    %164 = arith.divf %162, %163 : vector<2x256xf32>
    %165 = vector.extract_strided_slice %164 {offsets = [0, 0], sizes = [2, 128], strides = [1, 1]} : vector<2x256xf32> to vector<2x128xf32>
    %166 = vector.extract_strided_slice %164 {offsets = [0, 128], sizes = [2, 128], strides = [1, 1]} : vector<2x256xf32> to vector<2x128xf32>
    %167 = vector.extract_strided_slice %158 {offsets = [0, 256], sizes = [2, 128], strides = [1, 1]} : vector<2x512xf32> to vector<2x128xf32>
    %168 = math.tanh %167 : vector<2x128xf32>
    %169 = vector.extract_strided_slice %158 {offsets = [0, 384], sizes = [2, 128], strides = [1, 1]} : vector<2x512xf32> to vector<2x128xf32>
    %170 = arith.negf %169 : vector<2x128xf32>
    %171 = math.exp %170 : vector<2x128xf32>
    %cst_32 = arith.constant 1.000000e+00 : f32
    %172 = vector.broadcast %cst_32 : f32 to vector<2x128xf32>
    %173 = arith.addf %172, %171 : vector<2x128xf32>
    %174 = arith.divf %172, %173 : vector<2x128xf32>
    %175 = arith.mulf %166, %153 : vector<2x128xf32>
    %176 = arith.mulf %165, %168 : vector<2x128xf32>
    %177 = arith.addf %175, %176 : vector<2x128xf32>
    %178 = math.tanh %177 : vector<2x128xf32>
    %179 = arith.mulf %174, %178 : vector<2x128xf32>
    %180 = vector.extract_strided_slice %8 {offsets = [14, 0], sizes = [2, 512], strides = [1, 1]} : vector<16x512xf32> to vector<2x512xf32>
    %cst_33 = arith.constant dense<0.000000e+00> : vector<2x512xf32>
    %181 = tpu.matmul %179, %9, %cst_33 {dimension_numbers = #tpu.dot_dimension_numbers<[1], [0], [0], [1], [0, 0, 1, 1], [], []>} : vector<2x128xf32>, vector<128x512xf32>, vector<2x512xf32> -> vector<2x512xf32>
    %182 = arith.addf %180, %181 : vector<2x512xf32>
    %183 = vector.extract_strided_slice %182 {offsets = [0, 0], sizes = [2, 256], strides = [1, 1]} : vector<2x512xf32> to vector<2x256xf32>
    %184 = arith.negf %183 : vector<2x256xf32>
    %185 = math.exp %184 : vector<2x256xf32>
    %cst_34 = arith.constant 1.000000e+00 : f32
    %186 = vector.broadcast %cst_34 : f32 to vector<2x256xf32>
    %187 = arith.addf %186, %185 : vector<2x256xf32>
    %188 = arith.divf %186, %187 : vector<2x256xf32>
    %189 = vector.extract_strided_slice %188 {offsets = [0, 0], sizes = [2, 128], strides = [1, 1]} : vector<2x256xf32> to vector<2x128xf32>
    %190 = vector.extract_strided_slice %188 {offsets = [0, 128], sizes = [2, 128], strides = [1, 1]} : vector<2x256xf32> to vector<2x128xf32>
    %191 = vector.extract_strided_slice %182 {offsets = [0, 256], sizes = [2, 128], strides = [1, 1]} : vector<2x512xf32> to vector<2x128xf32>
    %192 = math.tanh %191 : vector<2x128xf32>
    %193 = vector.extract_strided_slice %182 {offsets = [0, 384], sizes = [2, 128], strides = [1, 1]} : vector<2x512xf32> to vector<2x128xf32>
    %194 = arith.negf %193 : vector<2x128xf32>
    %195 = math.exp %194 : vector<2x128xf32>
    %cst_35 = arith.constant 1.000000e+00 : f32
    %196 = vector.broadcast %cst_35 : f32 to vector<2x128xf32>
    %197 = arith.addf %196, %195 : vector<2x128xf32>
    %198 = arith.divf %196, %197 : vector<2x128xf32>
    %199 = arith.mulf %190, %177 : vector<2x128xf32>
    %200 = arith.mulf %189, %192 : vector<2x128xf32>
    %201 = arith.addf %199, %200 : vector<2x128xf32>
    %202 = math.tanh %201 : vector<2x128xf32>
    %203 = arith.mulf %198, %202 : vector<2x128xf32>
    %c0_36 = arith.constant 0 : index
    %c0_37 = arith.constant 0 : index
    %204 = vector.load %arg10[%c0_36, %c0_37] : memref<2x128xf32, #tpu.memory_space<vmem>>, vector<2x128xf32>
    tpu.vector_store %arg10[%c0_36, %c0_37], %203 {strides = array<i32>} : memref<2x128xf32, #tpu.memory_space<vmem>>, vector<2x128xf32>,
    %c0_38 = arith.constant 0 : index
    %c0_39 = arith.constant 0 : index
    %205 = vector.load %arg11[%c0_38, %c0_39] : memref<2x128xf32, #tpu.memory_space<vmem>>, vector<2x128xf32>
    tpu.vector_store %arg11[%c0_38, %c0_39], %201 {strides = array<i32>} : memref<2x128xf32, #tpu.memory_space<vmem>>, vector<2x128xf32>,
    %c0_i32_40 = arith.constant 0 : i32
    %206 = arith.cmpi eq, %arg0, %c0_i32_40 : i32
    %207 = arith.extui %206 : i1 to i32
    %c0_i32_41 = arith.constant 0 : i32
    %208 = arith.cmpi ne, %207, %c0_i32_41 : i32
    scf.if %208 {
      %cst_42 = arith.constant dense<0.000000e+00> : vector<128xf32>
      %209 = vector.multi_reduction <add>, %203, %cst_42 [0] : vector<2x128xf32> to vector<128xf32>
      %210 = vector.shape_cast %209 : vector<128xf32> to vector<1x128xf32>
      %cst_43 = arith.constant 2.000000e+00 : f32
      %211 = vector.broadcast %cst_43 : f32 to vector<1x128xf32>
      %212 = arith.divf %210, %211 : vector<1x128xf32>
      %213 = vector.broadcast %212 : vector<1x128xf32> to vector<2x128xf32>
      %214 = arith.subf %203, %213 : vector<2x128xf32>
      %215 = arith.mulf %214, %214 : vector<2x128xf32>
      %cst_44 = arith.constant dense<0.000000e+00> : vector<128xf32>
      %216 = vector.multi_reduction <add>, %215, %cst_44 [0] : vector<2x128xf32> to vector<128xf32>
      %217 = vector.shape_cast %216 : vector<128xf32> to vector<1x128xf32>
      %cst_45 = arith.constant 2.000000e+00 : f32
      %218 = vector.broadcast %cst_45 : f32 to vector<1x128xf32>
      %219 = arith.divf %217, %218 : vector<1x128xf32>
      %cst_46 = arith.constant 9.99999974E-6 : f32
      %220 = vector.broadcast %cst_46 : f32 to vector<1x128xf32>
      %221 = arith.addf %219, %220 : vector<1x128xf32>
      %222 = math.rsqrt %221 : vector<1x128xf32>
      %223 = vector.broadcast %222 : vector<1x128xf32> to vector<2x128xf32>
      %224 = arith.mulf %214, %223 : vector<2x128xf32>
      %c0_47 = arith.constant 0 : index
      %c0_48 = arith.constant 0 : index
      %225 = vector.load %arg5[%c0_47, %c0_48] : memref<1x128xf32, #tpu.memory_space<vmem>>, vector<1x128xf32>
      %226 = vector.broadcast %225 : vector<1x128xf32> to vector<2x128xf32>
      %227 = arith.mulf %224, %226 : vector<2x128xf32>
      %c0_49 = arith.constant 0 : index
      %c0_50 = arith.constant 0 : index
      %228 = vector.load %arg6[%c0_49, %c0_50] : memref<1x128xf32, #tpu.memory_space<vmem>>, vector<1x128xf32>
      %229 = vector.broadcast %228 : vector<1x128xf32> to vector<2x128xf32>
      %230 = arith.addf %227, %229 : vector<2x128xf32>
      %c0_51 = arith.constant 0 : index
      %c0_52 = arith.constant 0 : index
      %231 = vector.load %arg7[%c0_51, %c0_52] : memref<128x40xf32, #tpu.memory_space<vmem>>, vector<128x40xf32>
      %cst_53 = arith.constant dense<0.000000e+00> : vector<2x40xf32>
      %232 = tpu.matmul %230, %231, %cst_53 {dimension_numbers = #tpu.dot_dimension_numbers<[1], [0], [0], [1], [0, 0, 1, 1], [], []>} : vector<2x128xf32>, vector<128x40xf32>, vector<2x40xf32> -> vector<2x40xf32>
      %c0_54 = arith.constant 0 : index
      %c0_55 = arith.constant 0 : index
      %233 = vector.load %arg8[%c0_54, %c0_55] : memref<1x40xf32, #tpu.memory_space<vmem>>, vector<1x40xf32>
      %234 = vector.broadcast %233 : vector<1x40xf32> to vector<2x40xf32>
      %235 = arith.addf %232, %234 : vector<2x40xf32>
      %cst_56 = arith.constant 0.000000e+00 : f32
      %236 = vector.broadcast %cst_56 : f32 to vector<2x40xf32>
      %237 = arith.maximumf %235, %236 : vector<2x40xf32>
      %c0_57 = arith.constant 0 : index
      %c0_58 = arith.constant 0 : index
      %238 = vector.load %arg9[%c0_57, %c0_58] : memref<2x40xf32, #tpu.memory_space<vmem>>, vector<2x40xf32>
      tpu.vector_store %arg9[%c0_57, %c0_58], %237 {strides = array<i32>} : memref<2x40xf32, #tpu.memory_space<vmem>>, vector<2x40xf32>,
    } else {
    }
    return
  }
  func.func @transform_0(%arg0: i32) -> (i32, i32) {
    %c0_i32 = arith.constant 0 : i32
    %c0_i32_0 = arith.constant 0 : i32
    return %arg0, %c0_i32 : i32, i32
  }
  func.func @transform_1(%arg0: i32) -> (i32, i32) {
    %c0_i32 = arith.constant 0 : i32
    %c0_i32_0 = arith.constant 0 : i32
    %c0_i32_1 = arith.constant 0 : i32
    return %c0_i32, %c0_i32_0 : i32, i32
  }
  func.func @transform_2(%arg0: i32) -> (i32, i32) {
    %c0_i32 = arith.constant 0 : i32
    %c0_i32_0 = arith.constant 0 : i32
    %c0_i32_1 = arith.constant 0 : i32
    return %c0_i32, %c0_i32_0 : i32, i32
  }
  func.func @transform_3(%arg0: i32) -> (i32, i32) {
    %c0_i32 = arith.constant 0 : i32
    %c0_i32_0 = arith.constant 0 : i32
    %c0_i32_1 = arith.constant 0 : i32
    return %c0_i32, %c0_i32_0 : i32, i32
  }
  func.func @transform_4(%arg0: i32) -> (i32, i32) {
    %c0_i32 = arith.constant 0 : i32
    %c0_i32_0 = arith.constant 0 : i32
    %c0_i32_1 = arith.constant 0 : i32
    return %c0_i32, %c0_i32_0 : i32, i32
  }
  func.func @transform_5(%arg0: i32) -> (i32, i32) {
    %c0_i32 = arith.constant 0 : i32
    %c0_i32_0 = arith.constant 0 : i32
    %c0_i32_1 = arith.constant 0 : i32
    return %c0_i32, %c0_i32_0 : i32, i32
  }
  func.func @transform_6(%arg0: i32) -> (i32, i32) {
    %c0_i32 = arith.constant 0 : i32
    %c0_i32_0 = arith.constant 0 : i32
    %c0_i32_1 = arith.constant 0 : i32
    return %c0_i32, %c0_i32_0 : i32, i32
  }
  func.func @transform_7(%arg0: i32) -> (i32, i32) {
    %c0_i32 = arith.constant 0 : i32
    %c0_i32_0 = arith.constant 0 : i32
    %c0_i32_1 = arith.constant 0 : i32
    return %c0_i32, %c0_i32_0 : i32, i32
  }
  func.func @transform_8(%arg0: i32) -> (i32, i32) {
    %c0_i32 = arith.constant 0 : i32
    %c0_i32_0 = arith.constant 0 : i32
    %c0_i32_1 = arith.constant 0 : i32
    return %c0_i32, %c0_i32_0 : i32, i32
  }
}

</mosaic_0001>

<bundles_post_ra>
// kernel: tpu_custom_call.1
= control target key start
LH: loop header
LB: loop body
LE: loop exit
PB: predicated region body
PF: predicated region fallthrough
CT: control target
= control target key end

     0   :  { %13 = vsyncpa [#allocation5], 0  ;;  %s3431_s0 = inlined_call_operand.vmem [shape: f32[16,64], index: 0, kind: input, shape index: {}]   ;;  %s3432_s1 = inlined_call_operand.hbm [shape: f32[64,512], index: 1, kind: input, shape index: {}]   ;;  %s3433_s2 = inlined_call_operand.vmem [shape: f32[1,512], index: 2, kind: input, shape index: {}]   ;;  %s3434_s3 = inlined_call_operand.hbm [shape: f32[128,512], index: 3, kind: input, shape index: {}]   ;;  %s3435_s4 = inlined_call_operand.vmem [shape: f32[1,128], index: 4, kind: input, shape index: {}]   ;;  %s3436_s5 = inlined_call_operand.vmem [shape: f32[1,128], index: 5, kind: input, shape index: {}]   ;;  %s3437_s6 = inlined_call_operand.vmem [shape: f32[128,40], index: 6, kind: input, shape index: {}]   ;;  %s3438_s7 = inlined_call_operand.vmem [shape: f32[1,40], index: 7, kind: input, shape index: {}]   ;;  %s3439_s8 = inlined_call_operand.hbm [shape: f32[2,40], index: 8, kind: output, shape index: {}]  }
   0x1   :  { %14 = vsyncpa [#allocation8], 0 }
   0x2   :  { %15 = vsyncpa [#allocation6], 0  ;;  %s2841_s27 = smov [#allocation4]   ;;  %s2769_s9 = scalar_lea.hbm %s3432_s1, 4096 }
   0x3   :  { %s23_s28 = sshll.u32 %s2841_s27, 4  ;;  %p2770_p0 = scmp.ne.s32.totalorder %s3432_s1, %s2769_s9  ;;  %s24_s28 = int_to_ptr.vmem [resolvable:$true] %s23_s28 }
   0x4   :  { %p2773_p1 = scmp.lt.u32.totalorder %s2769_s9, %s3432_s1 }
   0x6   :  { %p2775_p2 = pnand %p2773_p1, %p2770_p0 }
   0x8   :  { %2778 = shalt.err (!%p2775_p2)
}
   0x9   :  { %s2779_s14 = scalar_lea.vmem %s24_s28, 4096  ;;  %p2784_p4 = scmp.lt.s32.totalorder %s24_s28, %s24_s28 }
   0xa   :  { %p2780_p3 = scmp.ne.s32.totalorder %s24_s28, %s2779_s14  ;;  %p2785_p5 = scmp.lt.s32.totalorder %s2779_s14, %s2779_s14 }
   0xc   :  { %p2786_p6 = por %p2785_p5, %p2784_p4 }
   0xe   :  { %p2787_p7 = pnand %p2786_p6, %p2780_p3 }
  0x10   :  { %2790 = shalt.err (!%p2787_p7)
}
  0x11   :  { %s2842_s15 = smov 512   ;;  %s2843_s16 = smov 32  }
  0x12   :  { %29 = dma.hbm_to_vmem [thread:$0]  %s3432_s1, 4096, %s24_s28, [#allocation5], %s2842_s15, %s2842_s15, %s2843_s16  }
  0x13   :  { %s2844_s19 = smov [#allocation7]   ;;  %s2791_s23 = scalar_lea.hbm %s3434_s3, 8192 }
  0x14   :  { %s37_s20 = sshll.u32 %s2844_s19, 4  ;;  %p2792_p8 = scmp.ne.s32.totalorder %s3434_s3, %s2791_s23  ;;  %s38_s20 = int_to_ptr.vmem [resolvable:$true] %s37_s20 }
  0x15   :  { %p2795_p9 = scmp.lt.u32.totalorder %s2791_s23, %s3434_s3 }
  0x17   :  { %p2797_p10 = pnand %p2795_p9, %p2792_p8 }
  0x19   :  { %2800 = shalt.err (!%p2797_p10)
}
  0x1a   :  { %s2801_s29 = scalar_lea.vmem %s38_s20, 8192  ;;  %p2806_p12 = scmp.lt.s32.totalorder %s38_s20, %s38_s20 }
  0x1b   :  { %p2802_p11 = scmp.ne.s32.totalorder %s38_s20, %s2801_s29  ;;  %p2807_p13 = scmp.lt.s32.totalorder %s2801_s29, %s2801_s29 }
  0x1d   :  { %p2808_p0 = por %p2807_p13, %p2806_p12 }
  0x1f   :  { %p2809_p1 = pnand %p2808_p0, %p2802_p11 }
  0x21   :  { %2812 = shalt.err (!%p2809_p1)
}
  0x22   :  { %43 = dma.hbm_to_vmem [thread:$0]  %s3434_s3, 8192, %s38_s20, [#allocation8], %s2842_s15, %s2842_s15, %s2843_s16  }
  0x23   :  { %2835 = dma.done.wait [#allocation5], 4096  }
  0x24   :  { %2836 = vsyncadd [#allocation5], 4294963200 }
  0x25   :  { %2837 = dma.done.wait [#allocation8], 8192  }
  0x26   :  { %2838 = vsyncadd [#allocation8], 4294959104  ;;  %v2845_v0 = vmov 0.0   ;;  %v67_v1 = vld [vmem:[#allocation4 + $0x8] sm:$0xff]  ;;  %v66_v6 = vld [vmem:[#allocation4] sm:$0xff]  ;;  %vm120_vm0 = vcmask 523264  }
  0x27   :  { %191 = vmatprep.mubr.f32.mxu1 %v2845_v0  ;;  %62 = vst [vmem:[#allocation2] sm:$0x3] %v2845_v0  ;;  %63 = vst [vmem:[#allocation3] sm:$0x3] %v2845_v0  ;;  %411 = vmatprep.mubr.f32.mxu0 %v2845_v0  ;;  %v71_v2 = vld [vmem:[#allocation4 + $0x28] sm:$0xff]  ;;  %v70_v7 = vld [vmem:[#allocation4 + $0x20] sm:$0xff] }
  0x28   :  { %v282_v3 = vld [vmem:[#allocation7 + $0x8] sm:$0xff]  ;;  %v2063_v4 = vpack.c.bf16 %v71_v2, %v67_v1  ;;  %v2065_v9 = vpack.c.bf16 %v70_v7, %v66_v6  ;;  %v281_v10 = vld [vmem:[#allocation7] sm:$0xff]  ;;  %v69_v47 = vld [vmem:[#allocation4 + $0x18] sm:$0xff]  ;;  %vm2847_vm1 = vmmov 0   ;;  %vm1823_vm2 = vcmask 1041408   ;;  %s2848_s22 = smov [#allocation9]  }
  0x29   :  { %v286_v5 = vld [vmem:[#allocation7 + $0x28] sm:$0xff]  ;;  %v285_v11 = vld [vmem:[#allocation7 + $0x20] sm:$0xff]  ;;  %v73_v48 = vld [vmem:[#allocation4 + $0x38] sm:$0xff]  ;;  %s1970_s23 = sshll.u32 %s2848_s22, 4  ;;  %vm1962_vm3 = vcmask 320512   ;;  %s1971_s23 = int_to_ptr.vmem [resolvable:$true] %s1970_s23 }
  0x2a   :  { %v2922_v8 = vpack.c.bf16 %v286_v5, %v282_v3  ;;  %v75_v12 = vld [vmem:[#allocation4 + $0x48] sm:$0xff]  ;;  %2064 = vmatprep.subr.bf16.mxu1 %v2063_v4  ;;  %v2924_v13 = vpack.c.bf16 %v285_v11, %v281_v10  ;;  %v74_v19 = vld [vmem:[#allocation4 + $0x40] sm:$0xff]  ;;  %v2079_v53 = vpack.c.bf16 %v73_v48, %v69_v47  ;;  %v68_v54 = vld [vmem:[#allocation4 + $0x10] sm:$0xff]  ;;  %p2818_p3 = scmp.lt.s32.totalorder %s1971_s23, %s1971_s23 }
  0x2b   :  { %v79_v14 = vld [vmem:[#allocation4 + $0x68] sm:$0xff]  ;;  %2066 = vmatpush1.bf16.msra.mxu1 %v2065_v9  ;;  %v78_v20 = vld [vmem:[#allocation4 + $0x60] sm:$0xff]  ;;  %v72_v55 = vld [vmem:[#allocation4 + $0x30] sm:$0xff] }
  0x2c   :  { %v290_v15 = vld [vmem:[#allocation7 + $0x48] sm:$0xff]  ;;  %2096 = vmatprep.subr.bf16.mxu0 %v2922_v8  ;;  %v2067_v17 = vpack.c.bf16 %v79_v14, %v75_v12  ;;  %v289_v21 = vld [vmem:[#allocation7 + $0x40] sm:$0xff]  ;;  %v2069_v22 = vpack.c.bf16 %v78_v20, %v74_v19  ;;  %v77_v59 = vld [vmem:[#allocation4 + $0x58] sm:$0xff]  ;;  %v2081_v1 = vpack.c.bf16 %v72_v55, %v68_v54 }
  0x2d   :  { %v294_v16 = vld [vmem:[#allocation7 + $0x68] sm:$0xff]  ;;  %2098 = vmatpush1.bf16.msra.mxu0 %v2924_v13  ;;  %v293_v23 = vld [vmem:[#allocation7 + $0x60] sm:$0xff]  ;;  %v81_v60 = vld [vmem:[#allocation4 + $0x78] sm:$0xff] }
  0x2e   :  { %v2927_v18 = vpack.c.bf16 %v294_v16, %v290_v15  ;;  %v83_v24 = vld [vmem:[#allocation4 + $0x88] sm:$0xff]  ;;  %2068 = vmatprep.subr.bf16.mxu1 %v2067_v17  ;;  %v2931_v26 = vpack.c.bf16 %v293_v23, %v289_v21  ;;  %v82_v30 = vld [vmem:[#allocation4 + $0x80] sm:$0xff]  ;;  %v2083_v3 = vpack.c.bf16 %v81_v60, %v77_v59  ;;  %v76_v4 = vld [vmem:[#allocation4 + $0x50] sm:$0xff] }
  0x2f   :  { %v87_v25 = vld [vmem:[#allocation4 + $0xa8] sm:$0xff]  ;;  %v86_v32 = vld [vmem:[#allocation4 + $0xa0] sm:$0xff]  ;;  %2070 = vmatpush1.bf16.msra.mxu1 %v2069_v22  ;;  %v80_v5 = vld [vmem:[#allocation4 + $0x70] sm:$0xff] }
  0x30   :  { %2100 = vmatprep.subr.bf16.mxu0 %v2927_v18  ;;  %v2071_v27 = vpack.c.bf16 %v87_v25, %v83_v24  ;;  %v298_v28 = vld [vmem:[#allocation7 + $0x88] sm:$0xff]  ;;  %v297_v33 = vld [vmem:[#allocation7 + $0x80] sm:$0xff]  ;;  %v2073_v35 = vpack.c.bf16 %v86_v32, %v82_v30  ;;  %v85_v10 = vld [vmem:[#allocation4 + $0x98] sm:$0xff]  ;;  %v2085_v15 = vpack.c.bf16 %v80_v5, %v76_v4 }
  0x31   :  { %v302_v29 = vld [vmem:[#allocation7 + $0xa8] sm:$0xff]  ;;  %v301_v34 = vld [vmem:[#allocation7 + $0xa0] sm:$0xff]  ;;  %2102 = vmatpush1.bf16.msra.mxu0 %v2931_v26  ;;  %v89_v11 = vld [vmem:[#allocation4 + $0xb8] sm:$0xff] }
  0x32   :  { %v2933_v31 = vpack.c.bf16 %v302_v29, %v298_v28  ;;  %v91_v36 = vld [vmem:[#allocation4 + $0xc8] sm:$0xff]  ;;  %2072 = vmatprep.subr.bf16.mxu1 %v2071_v27  ;;  %v2936_v39 = vpack.c.bf16 %v301_v34, %v297_v33  ;;  %v90_v42 = vld [vmem:[#allocation4 + $0xc0] sm:$0xff]  ;;  %v2087_v19 = vpack.c.bf16 %v89_v11, %v85_v10  ;;  %v84_v20 = vld [vmem:[#allocation4 + $0x90] sm:$0xff] }
  0x33   :  { %v95_v37 = vld [vmem:[#allocation4 + $0xe8] sm:$0xff]  ;;  %v94_v43 = vld [vmem:[#allocation4 + $0xe0] sm:$0xff]  ;;  %2074 = vmatpush1.bf16.msra.mxu1 %v2073_v35  ;;  %v88_v21 = vld [vmem:[#allocation4 + $0xb0] sm:$0xff] }
  0x34   :  { %v306_v38 = vld [vmem:[#allocation7 + $0xc8] sm:$0xff]  ;;  %v2075_v40 = vpack.c.bf16 %v95_v37, %v91_v36  ;;  %2104 = vmatprep.subr.bf16.mxu0 %v2933_v31  ;;  %v305_v45 = vld [vmem:[#allocation7 + $0xc0] sm:$0xff]  ;;  %v2077_v50 = vpack.c.bf16 %v94_v43, %v90_v42  ;;  %v93_v25 = vld [vmem:[#allocation4 + $0xd8] sm:$0xff]  ;;  %v2089_v30 = vpack.c.bf16 %v88_v21, %v84_v20 }
  0x35   :  { %v310_v41 = vld [vmem:[#allocation7 + $0xe8] sm:$0xff]  ;;  %v309_v46 = vld [vmem:[#allocation7 + $0xe0] sm:$0xff]  ;;  %2106 = vmatpush1.bf16.msra.mxu0 %v2936_v39  ;;  %v97_v27 = vld [vmem:[#allocation4 + $0xf8] sm:$0xff] }
  0x36   :  { %v2939_v44 = vpack.c.bf16 %v310_v41, %v306_v38  ;;  %v314_v49 = vld [vmem:[#allocation7 + $0x108] sm:$0xff]  ;;  %2076 = vmatprep.subr.bf16.mxu1 %v2075_v40  ;;  %v2942_v52 = vpack.c.bf16 %v309_v46, %v305_v45  ;;  %v313_v56 = vld [vmem:[#allocation7 + $0x100] sm:$0xff]  ;;  %v2091_v33 = vpack.c.bf16 %v97_v27, %v93_v25  ;;  %v92_v34 = vld [vmem:[#allocation4 + $0xd0] sm:$0xff] }
  0x37   :  { %v318_v51 = vld [vmem:[#allocation7 + $0x128] sm:$0xff]  ;;  %v317_v58 = vld [vmem:[#allocation7 + $0x120] sm:$0xff]  ;;  %2078 = vmatpush1.bf16.msra.mxu1 %v2077_v50  ;;  %v96_v35 = vld [vmem:[#allocation4 + $0xf0] sm:$0xff] }
  0x38   :  { %2108 = vmatprep.subr.bf16.mxu0 %v2939_v44  ;;  %v2945_v57 = vpack.c.bf16 %v318_v51, %v314_v49  ;;  %v322_v61 = vld [vmem:[#allocation7 + $0x148] sm:$0xff]  ;;  %v2950_v63 = vld [vmem:[%s3431_s0] sm:$0xff]  ;;  %2080 = vmatprep.subr.bf16.mxu1 %v2079_v53  ;;  %v2953_v2 = vpack.c.bf16 %v317_v58, %v313_v56  ;;  %v2093_v42 = vpack.c.bf16 %v96_v35, %v92_v34  ;;  %v283_v46 = vld [vmem:[#allocation7 + $0x10] sm:$0xff] }
  0x39   :  { %v326_v62 = vld [vmem:[#allocation7 + $0x168] sm:$0xff]  ;;  %2110 = vmatpush1.bf16.msra.mxu0 %v2942_v52  ;;  %v321_v6 = vld [vmem:[#allocation7 + $0x140] sm:$0xff]  ;;  %v284_v40 = vld [vmem:[#allocation7 + $0x18] sm:$0xff] }
  0x3a   :  { %2112 = vmatprep.subr.bf16.mxu0 %v2945_v57  ;;  %v2956_v7 = vpack.c.bf16 %v326_v62, %v322_v61  ;;  %v325_v9 = vld [vmem:[#allocation7 + $0x160] sm:$0xff]  ;;  %1980 = vmatmul.mubr.msk.f32.vlgmr.msra.gmra.mrb[0].mxu1 %vm120_vm0, %v2950_v63  ;;  %v330_v12 = vld [vmem:[#allocation7 + $0x188] sm:$0xff]  ;;  %v288_v41 = vld [vmem:[#allocation7 + $0x38] sm:$0xff] }
  0x3b   :  { %v334_v14 = vld [vmem:[#allocation7 + $0x1a8] sm:$0xff]  ;;  %2082 = vmatpush1.bf16.msra.mxu1 %v2081_v1  ;;  %197 = vmatprep.mubr.f32.mxu1 %v2845_v0  ;;  %v2967_v17 = vpack.c.bf16 %v325_v9, %v321_v6  ;;  %v329_v22 = vld [vmem:[#allocation7 + $0x180] sm:$0xff]  ;;  %v2984_v45 = vpack.c.bf16 %v288_v41, %v284_v40  ;;  %v287_v47 = vld [vmem:[#allocation7 + $0x30] sm:$0xff] }
  0x3c   :  { %v2964_v16 = vld [vmem:[%s3431_s0 + $0x8] sm:$0xff]  ;;  %2084 = vmatprep.subr.bf16.mxu1 %v2083_v3  ;;  %v2970_v23 = vpack.c.bf16 %v334_v14, %v330_v12  ;;  %v292_v48 = vld [vmem:[#allocation7 + $0x58] sm:$0xff]  ;;  %v2987_v50 = vpack.c.bf16 %v287_v47, %v283_v46  ;;  %v291_v54 = vld [vmem:[#allocation7 + $0x50] sm:$0xff]  ;;  %v100_v46 = vlaneseq }
  0x3d   :  { %2114 = vmatpush1.bf16.msra.mxu0 %v2953_v2  ;;  %v333_v24 = vld [vmem:[#allocation7 + $0x1a0] sm:$0xff]  ;;  %v338_v28 = vld [vmem:[#allocation7 + $0x1c8] sm:$0xff]  ;;  %v296_v49 = vld [vmem:[#allocation7 + $0x78] sm:$0xff] }
  0x3e   :  { %2116 = vmatprep.subr.bf16.mxu0 %v2956_v7  ;;  %1981 = vmatmul.mubr.msk.f32.gmra.mrb[2].mxu1 %vm120_vm0, %v2964_v16  ;;  %v342_v29 = vld [vmem:[#allocation7 + $0x1e8] sm:$0xff]  ;;  %v2976_v32 = vpack.c.bf16 %v333_v24, %v329_v22  ;;  %v337_v36 = vld [vmem:[#allocation7 + $0x1c0] sm:$0xff]  ;;  %v2990_v51 = vld [vmem:[#allocation2] sm:$0x3]  ;;  %v2993_v53 = vpack.c.bf16 %v296_v49, %v292_v48  ;;  %v101_v47 = vshrl.u32 %v100_v46, 7 }
  0x3f   :  { %2086 = vmatpush1.bf16.msra.mxu1 %v2085_v15  ;;  %268 = vmatprep.mubr.f32.mxu1 %v2845_v0  ;;  %v2979_v37 = vpack.c.bf16 %v342_v29, %v338_v28  ;;  %v341_v38 = vld [vmem:[#allocation7 + $0x1e0] sm:$0xff]  ;;  %v295_v55 = vld [vmem:[#allocation7 + $0x70] sm:$0xff]  ;;  %v300_v56 = vld [vmem:[#allocation7 + $0x98] sm:$0xff] }
  0x40   :  { %2088 = vmatprep.subr.bf16.mxu1 %v2087_v19  ;;  %v2982_v43 = vpack.c.bf16 %v341_v38, %v337_v36  ;;  %v304_v58 = vld [vmem:[#allocation7 + $0xb8] sm:$0xff]  ;;  %v3000_v59 = vpack.c.bf16 %v295_v55, %v291_v54  ;;  %v299_v61 = vld [vmem:[#allocation7 + $0x90] sm:$0xff]  ;;  %v102_v48 = vsub.s32 0, %v101_v47  ;;  %v106_v54 = vsub.s32 1, %v101_v47 }
  0x41   :  { %2118 = vmatpush1.bf16.msra.mxu0 %v2967_v17  ;;  %v3003_v60 = vpack.c.bf16 %v304_v58, %v300_v56  ;;  %v303_v62 = vld [vmem:[#allocation7 + $0xb0] sm:$0xff]  ;;  %v308_v1 = vld [vmem:[#allocation7 + $0xd8] sm:$0xff] }
  0x42   :  { %2120 = vmatprep.subr.bf16.mxu0 %v2970_v23  ;;  %v312_v3 = vld [vmem:[#allocation7 + $0xf8] sm:$0xff]  ;;  %v307_v5 = vld [vmem:[#allocation7 + $0xd0] sm:$0xff] }
  0x43   :  { %2090 = vmatpush1.bf16.msra.mxu1 %v2089_v30  ;;  %v3016_v4 = vpack.c.bf16 %v312_v3, %v308_v1  ;;  %v311_v6 = vld [vmem:[#allocation7 + $0xf0] sm:$0xff]  ;;  %v316_v9 = vld [vmem:[#allocation7 + $0x118] sm:$0xff] }
  0x44   :  { %2092 = vmatprep.subr.bf16.mxu1 %v2091_v33  ;;  %v320_v10 = vld [vmem:[#allocation7 + $0x138] sm:$0xff]  ;;  %v3021_v11 = vpack.c.bf16 %v311_v6, %v307_v5  ;;  %v315_v14 = vld [vmem:[#allocation7 + $0x110] sm:$0xff]  ;;  %v110_v5 = vsub.s32 2, %v101_v47 }
  0x45   :  { %2122 = vmatpush1.bf16.msra.mxu0 %v2976_v32  ;;  %v3024_v12 = vpack.c.bf16 %v320_v10, %v316_v9  ;;  %v319_v15 = vld [vmem:[#allocation7 + $0x130] sm:$0xff]  ;;  %v328_v19 = vld [vmem:[#allocation7 + $0x178] sm:$0xff]  ;;  %v114_v9 = vsub.s32 3, %v101_v47 }
  0x46   :  { %2124 = vmatprep.subr.bf16.mxu0 %v2979_v37  ;;  %v3029_v20 = vpack.c.bf16 %v319_v15, %v315_v14  ;;  %v323_v22 = vld [vmem:[#allocation7 + $0x150] sm:$0xff]  ;;  %v332_v25 = vld [vmem:[#allocation7 + $0x198] sm:$0xff] }
  0x47   :  { %2094 = vmatpush1.bf16.msra.mxu1 %v2093_v42  ;;  %v327_v24 = vld [vmem:[#allocation7 + $0x170] sm:$0xff]  ;;  %v336_v27 = vld [vmem:[#allocation7 + $0x1b8] sm:$0xff] }
  0x48   :  { %2128 = vmatprep.subr.bf16.mxu1 %v2984_v45  ;;  %v3037_v28 = vpack.c.bf16 %v327_v24, %v323_v22  ;;  %v3040_v29 = vpack.c.bf16 %v336_v27, %v332_v25  ;;  %v331_v30 = vld [vmem:[#allocation7 + $0x190] sm:$0xff]  ;;  %v340_v34 = vld [vmem:[#allocation7 + $0x1d8] sm:$0xff] }
  0x49   :  { %2126 = vmatpush1.bf16.msra.mxu0 %v2982_v43  ;;  %v335_v33 = vld [vmem:[#allocation7 + $0x1b0] sm:$0xff]  ;;  %v344_v35 = vld [vmem:[#allocation7 + $0x1f8] sm:$0xff] }
  0x4a   :  { %2160 = vmatprep.subr.bf16.mxu0 %v2922_v8  ;;  %1982 = vmatmul.mubr.msk.f32.vlgmr.msra.gmra.mrb[4].mxu1 %vm120_vm0, %v2950_v63  ;;  %v3012_v63 = vpack.c.bf16 %v303_v62, %v299_v61  ;;  %v3045_v36 = vpack.c.bf16 %v335_v33, %v331_v30  ;;  %v3048_v38 = vpack.c.bf16 %v344_v35, %v340_v34  ;;  %v339_v40 = vld [vmem:[#allocation7 + $0x1d0] sm:$0xff]  ;;  %v98_v49 = vld [vmem:[%s3433_s2] sm:$0xf] }
  0x4b   :  { %2130 = vmatpush1.bf16.msra.mxu1 %v2987_v50  ;;  %274 = vmatprep.mubr.f32.mxu1 %v2845_v0  ;;  %v343_v41 = vld [vmem:[#allocation7 + $0x1f0] sm:$0xff]  ;;  %v103_v56 = vrot.slane %v98_v49, %v102_v48  ;;  %v107_v58 = vrot.slane %v98_v49, %v106_v54 }
  0x4c   :  { %412 = vmatmul.mubr.f32.vlgmr.msra.gmra.mrb[0].mxu0 %v2990_v51  ;;  %2132 = vmatprep.subr.bf16.mxu1 %v2993_v53  ;;  %v3053_v42 = vpack.c.bf16 %v343_v41, %v339_v40 }
  0x4d   :  { %2162 = vmatpush1.bf16.msra.mxu0 %v2924_v13  ;;  %581 = vmatprep.mubr.f32.mxu0 %v2845_v0 }
  0x4e   :  { %1983 = vmatmul.mubr.msk.f32.gmra.mrb[6].mxu1 %vm120_vm0, %v2964_v16  ;;  %2164 = vmatprep.subr.bf16.mxu0 %v2927_v18  ;;  %v324_v16 = vld [vmem:[#allocation7 + $0x158] sm:$0xff] }
  0x4f   :  { %2134 = vmatpush1.bf16.msra.mxu1 %v3000_v59  ;;  %482 = vmatprep.mubr.f32.mxu1 %v2845_v0  ;;  %v3032_v21 = vpack.c.bf16 %v328_v19, %v324_v16  ;;  %v111_v16 = vrot.slane %v98_v49, %v110_v5  ;;  %v115_v19 = vrot.slane %v98_v49, %v114_v9  ;;  %v346_v9 = vld [vmem:[#allocation3] sm:$0x3] }
  0x50   :  { %2136 = vmatprep.subr.bf16.mxu1 %v3003_v60 }
  0x51   :  { %2166 = vmatpush1.bf16.msra.mxu0 %v2931_v26 }
  0x52   :  { %2168 = vmatprep.subr.bf16.mxu0 %v2933_v31 }
  0x53   :  { %2138 = vmatpush1.bf16.msra.mxu1 %v3012_v63 }
  0x54   :  { %2140 = vmatprep.subr.bf16.mxu1 %v3016_v4 }
  0x55   :  { %2170 = vmatpush1.bf16.msra.mxu0 %v2936_v39 }
  0x56   :  { %2172 = vmatprep.subr.bf16.mxu0 %v2939_v44 }
  0x57   :  { %2142 = vmatpush1.bf16.msra.mxu1 %v3021_v11 }
  0x58   :  { %2144 = vmatprep.subr.bf16.mxu1 %v3024_v12 }
  0x59   :  { %2174 = vmatpush1.bf16.msra.mxu0 %v2942_v52 }
  0x5a   :  { %2176 = vmatprep.subr.bf16.mxu0 %v2945_v57 }
  0x5b   :  { %2146 = vmatpush1.bf16.msra.mxu1 %v3029_v20 }
  0x5c   :  { %2148 = vmatprep.subr.bf16.mxu1 %v3032_v21 }
  0x5d   :  { %2178 = vmatpush1.bf16.msra.mxu0 %v2953_v2 }
  0x5e   :  { %2180 = vmatprep.subr.bf16.mxu0 %v2956_v7 }
  0x5f   :  { %2150 = vmatpush1.bf16.msra.mxu1 %v3037_v28 }
  0x60   :  { %2152 = vmatprep.subr.bf16.mxu1 %v3040_v29 }
  0x61   :  { %2182 = vmatpush1.bf16.msra.mxu0 %v2967_v17 }
  0x62   :  { %2184 = vmatprep.subr.bf16.mxu0 %v2970_v23 }
  0x63   :  { %2154 = vmatpush1.bf16.msra.mxu1 %v3045_v36 }
  0x64   :  { %2156 = vmatprep.subr.bf16.mxu1 %v3048_v38 }
  0x65   :  { %2186 = vmatpush1.bf16.msra.mxu0 %v2976_v32 }
  0x66   :  { %2188 = vmatprep.subr.bf16.mxu0 %v2979_v37 }
  0x67   :  { %2158 = vmatpush1.bf16.msra.mxu1 %v3053_v42 }
  0x68   :  { %2192 = vmatprep.subr.bf16.mxu1 %v2984_v45 }
  0x69   :  { %2190 = vmatpush1.bf16.msra.mxu0 %v2982_v43 }
  0x6a   :  { %483 = vmatmul.mubr.f32.vlgmr.msra.gmra.mrb[8].mxu1 %v2990_v51  ;;  %2224 = vmatprep.subr.bf16.mxu0 %v2922_v8 }
  0x6b   :  { %2194 = vmatpush1.bf16.msra.mxu1 %v2987_v50  ;;  %652 = vmatprep.mubr.f32.mxu1 %v2845_v0 }
  0x6c   :  { %2196 = vmatprep.subr.bf16.mxu1 %v2993_v53 }
  0x6f   :  { %2198 = vmatpush1.bf16.msra.mxu1 %v3000_v59 }
  0x70   :  { %2200 = vmatprep.subr.bf16.mxu1 %v3003_v60 }
  0x73   :  { %2202 = vmatpush1.bf16.msra.mxu1 %v3012_v63 }
  0x74   :  { %2204 = vmatprep.subr.bf16.mxu1 %v3016_v4 }
  0x77   :  { %2206 = vmatpush1.bf16.msra.mxu1 %v3021_v11 }
  0x78   :  { %2208 = vmatprep.subr.bf16.mxu1 %v3024_v12 }
  0x7b   :  { %2210 = vmatpush1.bf16.msra.mxu1 %v3029_v20 }
  0x7c   :  { %2212 = vmatprep.subr.bf16.mxu1 %v3032_v21 }
  0x7f   :  { %2214 = vmatpush1.bf16.msra.mxu1 %v3037_v28 }
  0x80   :  { %2216 = vmatprep.subr.bf16.mxu1 %v3040_v29 }
  0x83   :  { %2218 = vmatpush1.bf16.msra.mxu1 %v3045_v36 }
  0x84   :  { %2220 = vmatprep.subr.bf16.mxu1 %v3048_v38 }
  0x87   :  { %2222 = vmatpush1.bf16.msra.mxu1 %v3053_v42 }
  0x88   :  { %2256 = vmatprep.subr.bf16.mxu1 %v2984_v45 }
 0x10d   :  { %v193_v51 = vpop.f32.mrb[0].mxu1 }
 0x10e   :  { %v195_v55 = vpop.f32.mrb[1].mxu1  ;;  %v3093_v33 = vadd.f32 %v193_v51, %v103_v56 }
 0x10f   :  { %v3089_v27 = vadd.f32 %v195_v55, %v107_v58 }
 0x111   :  { %v199_v61 = vpop.f32.mrb[2].mxu1 }
 0x112   :  { %v3083_v62 = vadd.f32 %v199_v61, %v103_v56  ;;  %v201_v1 = vpop.f32.mrb[3].mxu1 }
 0x113   :  { %v3085_v3 = vadd.f32 %v201_v1, %v107_v58 }
 0x11d   :  { %v270_v6 = vpop.f32.mrb[4].mxu1 }
 0x11e   :  { %v272_v14 = vpop.f32.mrb[5].mxu1  ;;  %v3097_v54 = vadd.f32 %v270_v6, %v111_v16 }
 0x11f   :  { %v413_v10 = vpop.f32.mrb[0].mxu0  ;;  %v3099_v55 = vadd.f32 %v272_v14, %v115_v19 }
 0x120   :  { %v415_v15 = vpop.f32.mrb[1].mxu0  ;;  %v489_v35 = vadd.f32 %v413_v10, %v3093_v33 }
 0x121   :  { %v276_v22 = vpop.f32.mrb[6].mxu1  ;;  %v490_v34 = vadd.f32 %v415_v15, %v3089_v27 }
 0x122   :  { %v3087_v24 = vadd.f32 %v276_v22, %v111_v16  ;;  %v278_v25 = vpop.f32.mrb[7].mxu1  ;;  %v1984_v41 = vmul.f32 -1.442695, %v489_v35 }
 0x123   :  { %v3091_v30 = vadd.f32 %v278_v25, %v115_v19  ;;  %v1985_v40 = vmul.f32 -1.442695, %v490_v34 }
 0x125   :  { %2639 = vpow2.f32 %v1985_v40 }
 0x126   :  { %2641 = vpow2.f32 %v1984_v41 }
 0x12f   :  { %v2640_v46 = vpop.eup %2639 }
 0x130   :  { %v2642_v47 = vpop.eup %2641  ;;  %v500_v48 = vadd.f32 1.0, %v2640_v46 }
 0x131   :  { %v499_v49 = vadd.f32 1.0, %v2642_v47 }
 0x132   :  { %2643 = vrcp.f32 %v500_v48 }
 0x133   :  { %2645 = vrcp.f32 %v499_v49 }
 0x13c   :  { %v2644_v5 = vpop.eup %2643 }
 0x13d   :  { %v484_v58 = vpop.f32.mrb[8].mxu1  ;;  %v2646_v10 = vpop.eup %2645  ;;  %v512_v22 = vmul.f32 %v2644_v5, %v346_v9 }
 0x13e   :  { %v491_v51 = vadd.f32 %v484_v58, %v3097_v54  ;;  %v486_v56 = vpop.f32.mrb[9].mxu1 }
 0x13f   :  { %v492_v61 = vadd.f32 %v486_v56, %v3099_v55 }
 0x140   :  { %2647 = vtanh.f32 %v491_v51 }
 0x141   :  { %v1986_v1 = vmul.f32 -1.442695, %v492_v61 }
 0x143   :  { %2649 = vpow2.f32 %v1986_v1 }
 0x14a   :  { %v2648_v15 = vpop.eup %2647 }
 0x14b   :  { %v513_v6 = vmul.f32 %v2648_v15, %v2646_v10 }
 0x14d   :  { %v2650_v16 = vpop.eup %2649  ;;  %v3103_v14 = vadd.f32 %v513_v6, %v512_v22 }
 0x14e   :  { %v509_v19 = vadd.f32 1.0, %v2650_v16 }
 0x14f   :  { %2651 = vtanh.f32 %v3103_v14 }
 0x150   :  { %2653 = vrcp.f32 %v509_v19 }
 0x159   :  { %v2652_v25 = vpop.eup %2651 }
 0x15a   :  { %v2654_v34 = vpop.eup %2653 }
 0x15b   :  { %v516_v35 = vmul.f32 %v2654_v34, %v2652_v25 }
 0x15d   :  { %582 = vmatmul.mubr.f32.vlgmr.msra.gmra.mrb[2].mxu0 %v516_v35  ;;  %653 = vmatmul.mubr.f32.vlgmr.msra.gmra.mrb[10].mxu1 %v516_v35 }
 0x15e   :  { %2226 = vmatpush1.bf16.msra.mxu0 %v2924_v13  ;;  %2258 = vmatpush1.bf16.msra.mxu1 %v2987_v50 }
 0x15f   :  { %2228 = vmatprep.subr.bf16.mxu0 %v2927_v18  ;;  %2260 = vmatprep.subr.bf16.mxu1 %v2993_v53 }
 0x160   :  { %769 = vmatprep.mubr.f32.mxu0 %v2845_v0  ;;  %840 = vmatprep.mubr.f32.mxu1 %v2845_v0 }
 0x162   :  { %2230 = vmatpush1.bf16.msra.mxu0 %v2931_v26  ;;  %2262 = vmatpush1.bf16.msra.mxu1 %v3000_v59 }
 0x163   :  { %2232 = vmatprep.subr.bf16.mxu0 %v2933_v31  ;;  %2264 = vmatprep.subr.bf16.mxu1 %v3003_v60 }
 0x166   :  { %2234 = vmatpush1.bf16.msra.mxu0 %v2936_v39  ;;  %2266 = vmatpush1.bf16.msra.mxu1 %v3012_v63 }
 0x167   :  { %2236 = vmatprep.subr.bf16.mxu0 %v2939_v44  ;;  %2268 = vmatprep.subr.bf16.mxu1 %v3016_v4 }
 0x16a   :  { %2238 = vmatpush1.bf16.msra.mxu0 %v2942_v52  ;;  %2270 = vmatpush1.bf16.msra.mxu1 %v3021_v11 }
 0x16b   :  { %2240 = vmatprep.subr.bf16.mxu0 %v2945_v57  ;;  %2272 = vmatprep.subr.bf16.mxu1 %v3024_v12 }
 0x16e   :  { %2242 = vmatpush1.bf16.msra.mxu0 %v2953_v2  ;;  %2274 = vmatpush1.bf16.msra.mxu1 %v3029_v20 }
 0x16f   :  { %2244 = vmatprep.subr.bf16.mxu0 %v2956_v7  ;;  %2276 = vmatprep.subr.bf16.mxu1 %v3032_v21 }
 0x172   :  { %2246 = vmatpush1.bf16.msra.mxu0 %v2967_v17  ;;  %2278 = vmatpush1.bf16.msra.mxu1 %v3037_v28 }
 0x173   :  { %2248 = vmatprep.subr.bf16.mxu0 %v2970_v23  ;;  %2280 = vmatprep.subr.bf16.mxu1 %v3040_v29 }
 0x176   :  { %2250 = vmatpush1.bf16.msra.mxu0 %v2976_v32  ;;  %2282 = vmatpush1.bf16.msra.mxu1 %v3045_v36 }
 0x177   :  { %2252 = vmatprep.subr.bf16.mxu0 %v2979_v37  ;;  %2284 = vmatprep.subr.bf16.mxu1 %v3048_v38 }
 0x17a   :  { %2254 = vmatpush1.bf16.msra.mxu0 %v2982_v43  ;;  %2286 = vmatpush1.bf16.msra.mxu1 %v3053_v42 }
 0x17b   :  { %2288 = vmatprep.subr.bf16.mxu0 %v2922_v8  ;;  %2320 = vmatprep.subr.bf16.mxu1 %v2984_v45 }
 0x230   :  { %v583_v40 = vpop.f32.mrb[2].mxu0  ;;  %v654_v41 = vpop.f32.mrb[10].mxu1 }
 0x231   :  { %v663_v46 = vrot.slane %v583_v40, 6  ;;  %v585_v47 = vpop.f32.mrb[3].mxu0  ;;  %v656_v48 = vpop.f32.mrb[11].mxu1  ;;  %v665_v9 = vrot.slane %v654_v41, 6  ;;  %v695_v40 = vrot.slane %v3103_v14, 6 }
 0x232   :  { %v664_v49 = vrot.slane %v585_v47, 6  ;;  %v666_v1 = vrot.slane %v656_v48, 6 }
 0x233   :  { %v671_v58 = vadd.f32 %v663_v46, %v3093_v33  ;;  %v673_v15 = vadd.f32 %v665_v9, %v3097_v54 }
 0x234   :  { %v672_v51 = vadd.f32 %v664_v49, %v3089_v27  ;;  %v674_v5 = vadd.f32 %v666_v1, %v3099_v55 }
 0x235   :  { %v1987_v56 = vmul.f32 -1.442695, %v671_v58 }
 0x236   :  { %v1988_v61 = vmul.f32 -1.442695, %v672_v51  ;;  %v1989_v10 = vmul.f32 -1.442695, %v674_v5 }
 0x237   :  { %2655 = vpow2.f32 %v1987_v56 }
 0x238   :  { %2657 = vpow2.f32 %v1988_v61 }
 0x239   :  { %2659 = vpow2.f32 %v1989_v10 }
 0x23a   :  { %2661 = vtanh.f32 %v673_v15 }
 0x241   :  { %v2656_v22 = vpop.eup %2655 }
 0x242   :  { %v2658_v6 = vpop.eup %2657  ;;  %v681_v16 = vadd.f32 1.0, %v2656_v22 }
 0x243   :  { %v682_v19 = vadd.f32 1.0, %v2658_v6  ;;  %v2660_v25 = vpop.eup %2659 }
 0x244   :  { %2663 = vrcp.f32 %v681_v16  ;;  %v2662_v34 = vpop.eup %2661  ;;  %v691_v48 = vadd.f32 1.0, %v2660_v25 }
 0x245   :  { %2665 = vrcp.f32 %v682_v19 }
 0x246   :  { %2667 = vrcp.f32 %v691_v48 }
 0x24e   :  { %v2664_v35 = vpop.eup %2663 }
 0x24f   :  { %v2666_v46 = vpop.eup %2665  ;;  %v698_v47 = vmul.f32 %v2664_v35, %v2662_v34 }
 0x250   :  { %v697_v41 = vmul.f32 %v2666_v46, %v695_v40  ;;  %v2668_v58 = vpop.eup %2667 }
 0x252   :  { %v3145_v49 = vadd.f32 %v698_v47, %v697_v41 }
 0x254   :  { %2669 = vtanh.f32 %v3145_v49 }
 0x25e   :  { %v2670_v51 = vpop.eup %2669 }
 0x25f   :  { %v701_v56 = vmul.f32 %v2670_v51, %v2668_v58 }
 0x261   :  { %v703_v61 = vrot.slane %v701_v56, 2 }
 0x263   :  { %770 = vmatmul.mubr.f32.vlgmr.msra.gmra.mrb[4].mxu0 %v703_v61  ;;  %841 = vmatmul.mubr.f32.vlgmr.msra.gmra.mrb[12].mxu1 %v703_v61 }
 0x264   :  { %2290 = vmatpush1.bf16.msra.mxu0 %v2924_v13  ;;  %2322 = vmatpush1.bf16.msra.mxu1 %v2987_v50 }
 0x265   :  { %2292 = vmatprep.subr.bf16.mxu0 %v2927_v18  ;;  %2324 = vmatprep.subr.bf16.mxu1 %v2993_v53 }
 0x266   :  { %957 = vmatprep.mubr.f32.mxu0 %v2845_v0  ;;  %1028 = vmatprep.mubr.f32.mxu1 %v2845_v0 }
 0x268   :  { %2294 = vmatpush1.bf16.msra.mxu0 %v2931_v26  ;;  %2326 = vmatpush1.bf16.msra.mxu1 %v3000_v59 }
 0x269   :  { %2296 = vmatprep.subr.bf16.mxu0 %v2933_v31  ;;  %2328 = vmatprep.subr.bf16.mxu1 %v3003_v60 }
 0x26c   :  { %2298 = vmatpush1.bf16.msra.mxu0 %v2936_v39  ;;  %2330 = vmatpush1.bf16.msra.mxu1 %v3012_v63 }
 0x26d   :  { %2300 = vmatprep.subr.bf16.mxu0 %v2939_v44  ;;  %2332 = vmatprep.subr.bf16.mxu1 %v3016_v4 }
 0x270   :  { %2302 = vmatpush1.bf16.msra.mxu0 %v2942_v52  ;;  %2334 = vmatpush1.bf16.msra.mxu1 %v3021_v11 }
 0x271   :  { %2304 = vmatprep.subr.bf16.mxu0 %v2945_v57  ;;  %2336 = vmatprep.subr.bf16.mxu1 %v3024_v12 }
 0x274   :  { %2306 = vmatpush1.bf16.msra.mxu0 %v2953_v2  ;;  %2338 = vmatpush1.bf16.msra.mxu1 %v3029_v20 }
 0x275   :  { %2308 = vmatprep.subr.bf16.mxu0 %v2956_v7  ;;  %2340 = vmatprep.subr.bf16.mxu1 %v3032_v21 }
 0x278   :  { %2310 = vmatpush1.bf16.msra.mxu0 %v2967_v17  ;;  %2342 = vmatpush1.bf16.msra.mxu1 %v3037_v28 }
 0x279   :  { %2312 = vmatprep.subr.bf16.mxu0 %v2970_v23  ;;  %2344 = vmatprep.subr.bf16.mxu1 %v3040_v29 }
 0x27c   :  { %2314 = vmatpush1.bf16.msra.mxu0 %v2976_v32  ;;  %2346 = vmatpush1.bf16.msra.mxu1 %v3045_v36 }
 0x27d   :  { %2316 = vmatprep.subr.bf16.mxu0 %v2979_v37  ;;  %2348 = vmatprep.subr.bf16.mxu1 %v3048_v38 }
 0x280   :  { %2318 = vmatpush1.bf16.msra.mxu0 %v2982_v43  ;;  %2350 = vmatpush1.bf16.msra.mxu1 %v3053_v42 }
 0x281   :  { %2352 = vmatprep.subr.bf16.mxu0 %v2922_v8  ;;  %2384 = vmatprep.subr.bf16.mxu1 %v2984_v45 }
 0x336   :  { %v771_v14 = vpop.f32.mrb[4].mxu0  ;;  %v842_v1 = vpop.f32.mrb[12].mxu1 }
 0x337   :  { %v851_v5 = vrot.slane %v771_v14, 4  ;;  %v773_v9 = vpop.f32.mrb[5].mxu0  ;;  %v844_v10 = vpop.f32.mrb[13].mxu1  ;;  %v853_v35 = vrot.slane %v842_v1, 4  ;;  %v883_v14 = vrot.slane %v3145_v49, 6 }
 0x338   :  { %v852_v15 = vrot.slane %v773_v9, 4  ;;  %v854_v25 = vrot.slane %v844_v10, 4 }
 0x339   :  { %v859_v22 = vadd.f32 %v851_v5, %v3093_v33  ;;  %v861_v46 = vadd.f32 %v853_v35, %v3097_v54 }
 0x33a   :  { %v860_v6 = vadd.f32 %v852_v15, %v3089_v27  ;;  %v862_v34 = vadd.f32 %v854_v25, %v3099_v55 }
 0x33b   :  { %v1990_v16 = vmul.f32 -1.442695, %v859_v22 }
 0x33c   :  { %v1991_v19 = vmul.f32 -1.442695, %v860_v6  ;;  %v1992_v40 = vmul.f32 -1.442695, %v862_v34 }
 0x33d   :  { %2671 = vpow2.f32 %v1990_v16 }
 0x33e   :  { %2673 = vpow2.f32 %v1991_v19 }
 0x33f   :  { %2675 = vpow2.f32 %v1992_v40 }
 0x340   :  { %2677 = vtanh.f32 %v861_v46 }
 0x347   :  { %v2672_v47 = vpop.eup %2671 }
 0x348   :  { %v2674_v48 = vpop.eup %2673  ;;  %v869_v41 = vadd.f32 1.0, %v2672_v47 }
 0x349   :  { %v870_v58 = vadd.f32 1.0, %v2674_v48  ;;  %v2676_v51 = vpop.eup %2675 }
 0x34a   :  { %2679 = vrcp.f32 %v869_v41  ;;  %v2678_v56 = vpop.eup %2677  ;;  %v879_v10 = vadd.f32 1.0, %v2676_v51 }
 0x34b   :  { %2681 = vrcp.f32 %v870_v58 }
 0x34c   :  { %2683 = vrcp.f32 %v879_v10 }
 0x354   :  { %v2680_v61 = vpop.eup %2679 }
 0x355   :  { %v2682_v5 = vpop.eup %2681  ;;  %v886_v9 = vmul.f32 %v2680_v61, %v2678_v56 }
 0x356   :  { %v885_v1 = vmul.f32 %v2682_v5, %v883_v14  ;;  %v2684_v22 = vpop.eup %2683 }
 0x358   :  { %v3187_v15 = vadd.f32 %v886_v9, %v885_v1 }
 0x35a   :  { %2685 = vtanh.f32 %v3187_v15 }
 0x364   :  { %v2686_v6 = vpop.eup %2685 }
 0x365   :  { %v889_v16 = vmul.f32 %v2686_v6, %v2684_v22 }
 0x367   :  { %v891_v19 = vrot.slane %v889_v16, 4  ;;  %v1071_v16 = vrot.slane %v3187_v15, 6 }
 0x369   :  { %958 = vmatmul.mubr.f32.vlgmr.msra.gmra.mrb[6].mxu0 %v891_v19  ;;  %1029 = vmatmul.mubr.f32.vlgmr.msra.gmra.mrb[14].mxu1 %v891_v19 }
 0x36a   :  { %2354 = vmatpush1.bf16.msra.mxu0 %v2924_v13  ;;  %2386 = vmatpush1.bf16.msra.mxu1 %v2987_v50 }
 0x36b   :  { %2356 = vmatprep.subr.bf16.mxu0 %v2927_v18  ;;  %2388 = vmatprep.subr.bf16.mxu1 %v2993_v53 }
 0x36c   :  { %1145 = vmatprep.mubr.f32.mxu0 %v2845_v0  ;;  %1216 = vmatprep.mubr.f32.mxu1 %v2845_v0 }
 0x36e   :  { %2358 = vmatpush1.bf16.msra.mxu0 %v2931_v26  ;;  %2390 = vmatpush1.bf16.msra.mxu1 %v3000_v59 }
 0x36f   :  { %2360 = vmatprep.subr.bf16.mxu0 %v2933_v31  ;;  %2392 = vmatprep.subr.bf16.mxu1 %v3003_v60 }
 0x372   :  { %2362 = vmatpush1.bf16.msra.mxu0 %v2936_v39  ;;  %2394 = vmatpush1.bf16.msra.mxu1 %v3012_v63 }
 0x373   :  { %2364 = vmatprep.subr.bf16.mxu0 %v2939_v44  ;;  %2396 = vmatprep.subr.bf16.mxu1 %v3016_v4 }
 0x376   :  { %2366 = vmatpush1.bf16.msra.mxu0 %v2942_v52  ;;  %2398 = vmatpush1.bf16.msra.mxu1 %v3021_v11 }
 0x377   :  { %2368 = vmatprep.subr.bf16.mxu0 %v2945_v57  ;;  %2400 = vmatprep.subr.bf16.mxu1 %v3024_v12 }
 0x37a   :  { %2370 = vmatpush1.bf16.msra.mxu0 %v2953_v2  ;;  %2402 = vmatpush1.bf16.msra.mxu1 %v3029_v20 }
 0x37b   :  { %2372 = vmatprep.subr.bf16.mxu0 %v2956_v7  ;;  %2404 = vmatprep.subr.bf16.mxu1 %v3032_v21 }
 0x37e   :  { %2374 = vmatpush1.bf16.msra.mxu0 %v2967_v17  ;;  %2406 = vmatpush1.bf16.msra.mxu1 %v3037_v28 }
 0x37f   :  { %2376 = vmatprep.subr.bf16.mxu0 %v2970_v23  ;;  %2408 = vmatprep.subr.bf16.mxu1 %v3040_v29 }
 0x382   :  { %2378 = vmatpush1.bf16.msra.mxu0 %v2976_v32  ;;  %2410 = vmatpush1.bf16.msra.mxu1 %v3045_v36 }
 0x383   :  { %2380 = vmatprep.subr.bf16.mxu0 %v2979_v37  ;;  %2412 = vmatprep.subr.bf16.mxu1 %v3048_v38 }
 0x386   :  { %2382 = vmatpush1.bf16.msra.mxu0 %v2982_v43  ;;  %2414 = vmatpush1.bf16.msra.mxu1 %v3053_v42 }
 0x387   :  { %2416 = vmatprep.subr.bf16.mxu0 %v2922_v8  ;;  %2448 = vmatprep.subr.bf16.mxu1 %v2984_v45 }
 0x43c   :  { %v959_v49 = vpop.f32.mrb[6].mxu0  ;;  %v1030_v25 = vpop.f32.mrb[14].mxu1 }
 0x43d   :  { %v1039_v34 = vrot.slane %v959_v49, 2  ;;  %v961_v35 = vpop.f32.mrb[7].mxu0  ;;  %v1032_v40 = vpop.f32.mrb[15].mxu1  ;;  %v1041_v61 = vrot.slane %v1030_v25, 2 }
 0x43e   :  { %v1040_v46 = vrot.slane %v961_v35, 2  ;;  %v1042_v51 = vrot.slane %v1032_v40, 2 }
 0x43f   :  { %v1047_v47 = vadd.f32 %v1039_v34, %v3093_v33  ;;  %v1049_v5 = vadd.f32 %v1041_v61, %v3097_v54 }
 0x440   :  { %v1048_v48 = vadd.f32 %v1040_v46, %v3089_v27  ;;  %v1050_v56 = vadd.f32 %v1042_v51, %v3099_v55 }
 0x441   :  { %v1993_v41 = vmul.f32 -1.442695, %v1047_v47 }
 0x442   :  { %v1994_v58 = vmul.f32 -1.442695, %v1048_v48  ;;  %v1995_v14 = vmul.f32 -1.442695, %v1050_v56 }
 0x443   :  { %2687 = vpow2.f32 %v1993_v41 }
 0x444   :  { %2689 = vpow2.f32 %v1994_v58 }
 0x445   :  { %2691 = vpow2.f32 %v1995_v14 }
 0x446   :  { %2693 = vtanh.f32 %v1049_v5 }
 0x44d   :  { %v2688_v9 = vpop.eup %2687 }
 0x44e   :  { %v2690_v10 = vpop.eup %2689  ;;  %v1057_v1 = vadd.f32 1.0, %v2688_v9 }
 0x44f   :  { %v1058_v22 = vadd.f32 1.0, %v2690_v10  ;;  %v2692_v27 = vpop.eup %2691 }
 0x450   :  { %2695 = vrcp.f32 %v1057_v1  ;;  %v2694_v33 = vpop.eup %2693  ;;  %v1067_v55 = vadd.f32 1.0, %v2692_v27 }
 0x451   :  { %2697 = vrcp.f32 %v1058_v22 }
 0x452   :  { %2699 = vrcp.f32 %v1067_v55 }
 0x45a   :  { %v2696_v6 = vpop.eup %2695 }
 0x45b   :  { %v2698_v19 = vpop.eup %2697  ;;  %v1074_v49 = vmul.f32 %v2696_v6, %v2694_v33 }
 0x45c   :  { %v1073_v25 = vmul.f32 %v2698_v19, %v1071_v16  ;;  %v2700_v54 = vpop.eup %2699 }
 0x45e   :  { %v3229_v34 = vadd.f32 %v1074_v49, %v1073_v25 }
 0x460   :  { %2701 = vtanh.f32 %v3229_v34  ;;  %v1247_v19 = vrot.slane %v3229_v34, 6 }
 0x46a   :  { %v2702_v35 = vpop.eup %2701 }
 0x46b   :  { %v1077_v40 = vmul.f32 %v2702_v35, %v2700_v54 }
 0x46d   :  { %v1079_v46 = vrot.slane %v1077_v40, 6 }
 0x46f   :  { %1146 = vmatmul.mubr.f32.vlgmr.msra.gmra.mrb[8].mxu0 %v1079_v46  ;;  %1217 = vmatmul.mubr.f32.vlgmr.msra.gmra.mrb[16].mxu1 %v1079_v46 }
 0x470   :  { %2418 = vmatpush1.bf16.msra.mxu0 %v2924_v13  ;;  %2450 = vmatpush1.bf16.msra.mxu1 %v2987_v50 }
 0x471   :  { %2420 = vmatprep.subr.bf16.mxu0 %v2927_v18  ;;  %2452 = vmatprep.subr.bf16.mxu1 %v2993_v53 }
 0x472   :  { %1318 = vmatprep.mubr.f32.mxu0 %v2845_v0  ;;  %1389 = vmatprep.mubr.f32.mxu1 %v2845_v0 }
 0x474   :  { %2422 = vmatpush1.bf16.msra.mxu0 %v2931_v26  ;;  %2454 = vmatpush1.bf16.msra.mxu1 %v3000_v59 }
 0x475   :  { %2424 = vmatprep.subr.bf16.mxu0 %v2933_v31  ;;  %2456 = vmatprep.subr.bf16.mxu1 %v3003_v60 }
 0x478   :  { %2426 = vmatpush1.bf16.msra.mxu0 %v2936_v39  ;;  %2458 = vmatpush1.bf16.msra.mxu1 %v3012_v63 }
 0x479   :  { %2428 = vmatprep.subr.bf16.mxu0 %v2939_v44  ;;  %2460 = vmatprep.subr.bf16.mxu1 %v3016_v4 }
 0x47c   :  { %2430 = vmatpush1.bf16.msra.mxu0 %v2942_v52  ;;  %2462 = vmatpush1.bf16.msra.mxu1 %v3021_v11 }
 0x47d   :  { %2432 = vmatprep.subr.bf16.mxu0 %v2945_v57  ;;  %2464 = vmatprep.subr.bf16.mxu1 %v3024_v12 }
 0x480   :  { %2434 = vmatpush1.bf16.msra.mxu0 %v2953_v2  ;;  %2466 = vmatpush1.bf16.msra.mxu1 %v3029_v20 }
 0x481   :  { %2436 = vmatprep.subr.bf16.mxu0 %v2956_v7  ;;  %2468 = vmatprep.subr.bf16.mxu1 %v3032_v21 }
 0x484   :  { %2438 = vmatpush1.bf16.msra.mxu0 %v2967_v17  ;;  %2470 = vmatpush1.bf16.msra.mxu1 %v3037_v28 }
 0x485   :  { %2440 = vmatprep.subr.bf16.mxu0 %v2970_v23  ;;  %2472 = vmatprep.subr.bf16.mxu1 %v3040_v29 }
 0x488   :  { %2442 = vmatpush1.bf16.msra.mxu0 %v2976_v32  ;;  %2474 = vmatpush1.bf16.msra.mxu1 %v3045_v36 }
 0x489   :  { %2444 = vmatprep.subr.bf16.mxu0 %v2979_v37  ;;  %2476 = vmatprep.subr.bf16.mxu1 %v3048_v38 }
 0x48c   :  { %2446 = vmatpush1.bf16.msra.mxu0 %v2982_v43  ;;  %2478 = vmatpush1.bf16.msra.mxu1 %v3053_v42 }
 0x48d   :  { %2480 = vmatprep.subr.bf16.mxu0 %v2922_v8  ;;  %2512 = vmatprep.subr.bf16.mxu1 %v2984_v45 }
 0x542   :  { %v1147_v15 = vpop.f32.mrb[8].mxu0  ;;  %v1218_v47 = vpop.f32.mrb[16].mxu1 }
 0x543   :  { %v1223_v48 = vadd.f32 %v1147_v15, %v3083_v62  ;;  %v1149_v41 = vpop.f32.mrb[9].mxu0  ;;  %v1220_v58 = vpop.f32.mrb[17].mxu1  ;;  %v1225_v9 = vadd.f32 %v1218_v47, %v3087_v24 }
 0x544   :  { %v1224_v51 = vadd.f32 %v1149_v41, %v3085_v3  ;;  %v1226_v14 = vadd.f32 %v1220_v58, %v3091_v30 }
 0x545   :  { %v1996_v56 = vmul.f32 -1.442695, %v1223_v48 }
 0x546   :  { %v1997_v61 = vmul.f32 -1.442695, %v1224_v51  ;;  %v1998_v5 = vmul.f32 -1.442695, %v1226_v14 }
 0x547   :  { %2703 = vpow2.f32 %v1996_v56 }
 0x548   :  { %2705 = vpow2.f32 %v1997_v61 }
 0x549   :  { %2707 = vpow2.f32 %v1998_v5 }
 0x54a   :  { %2709 = vtanh.f32 %v1225_v9 }
 0x551   :  { %v2704_v10 = vpop.eup %2703 }
 0x552   :  { %v2706_v1 = vpop.eup %2705  ;;  %v1233_v22 = vadd.f32 1.0, %v2704_v10 }
 0x553   :  { %v1234_v27 = vadd.f32 1.0, %v2706_v1  ;;  %v2708_v33 = vpop.eup %2707 }
 0x554   :  { %2711 = vrcp.f32 %v1233_v22  ;;  %v2710_v6 = vpop.eup %2709  ;;  %v1243_v25 = vadd.f32 1.0, %v2708_v33 }
 0x555   :  { %2713 = vrcp.f32 %v1234_v27 }
 0x556   :  { %2715 = vrcp.f32 %v1243_v25 }
 0x55e   :  { %v2712_v16 = vpop.eup %2711 }
 0x55f   :  { %v2714_v49 = vpop.eup %2713  ;;  %v1250_v55 = vmul.f32 %v2712_v16, %v2710_v6 }
 0x560   :  { %v1249_v54 = vmul.f32 %v2714_v49, %v1247_v19  ;;  %v2716_v40 = vpop.eup %2715 }
 0x562   :  { %v3271_v35 = vadd.f32 %v1250_v55, %v1249_v54 }
 0x564   :  { %2717 = vtanh.f32 %v3271_v35  ;;  %v1432_v55 = vrot.slane %v3271_v35, 6 }
 0x56e   :  { %v2718_v46 = vpop.eup %2717 }
 0x56f   :  { %v1253_v15 = vmul.f32 %v2718_v46, %v2716_v40 }
 0x571   :  { %1319 = vmatmul.mubr.f32.vlgmr.msra.gmra.mrb[10].mxu0 %v1253_v15  ;;  %1390 = vmatmul.mubr.f32.vlgmr.msra.gmra.mrb[18].mxu1 %v1253_v15 }
 0x572   :  { %2482 = vmatpush1.bf16.msra.mxu0 %v2924_v13  ;;  %2514 = vmatpush1.bf16.msra.mxu1 %v2987_v50 }
 0x573   :  { %2484 = vmatprep.subr.bf16.mxu0 %v2927_v18  ;;  %2516 = vmatprep.subr.bf16.mxu1 %v2993_v53 }
 0x574   :  { %1506 = vmatprep.mubr.f32.mxu0 %v2845_v0  ;;  %1577 = vmatprep.mubr.f32.mxu1 %v2845_v0 }
 0x576   :  { %2486 = vmatpush1.bf16.msra.mxu0 %v2931_v26  ;;  %2518 = vmatpush1.bf16.msra.mxu1 %v3000_v59 }
 0x577   :  { %2488 = vmatprep.subr.bf16.mxu0 %v2933_v31  ;;  %2520 = vmatprep.subr.bf16.mxu1 %v3003_v60 }
 0x57a   :  { %2490 = vmatpush1.bf16.msra.mxu0 %v2936_v39  ;;  %2522 = vmatpush1.bf16.msra.mxu1 %v3012_v63 }
 0x57b   :  { %2492 = vmatprep.subr.bf16.mxu0 %v2939_v44  ;;  %2524 = vmatprep.subr.bf16.mxu1 %v3016_v4 }
 0x57e   :  { %2494 = vmatpush1.bf16.msra.mxu0 %v2942_v52  ;;  %2526 = vmatpush1.bf16.msra.mxu1 %v3021_v11 }
 0x57f   :  { %2496 = vmatprep.subr.bf16.mxu0 %v2945_v57  ;;  %2528 = vmatprep.subr.bf16.mxu1 %v3024_v12 }
 0x582   :  { %2498 = vmatpush1.bf16.msra.mxu0 %v2953_v2  ;;  %2530 = vmatpush1.bf16.msra.mxu1 %v3029_v20 }
 0x583   :  { %2500 = vmatprep.subr.bf16.mxu0 %v2956_v7  ;;  %2532 = vmatprep.subr.bf16.mxu1 %v3032_v21 }
 0x586   :  { %2502 = vmatpush1.bf16.msra.mxu0 %v2967_v17  ;;  %2534 = vmatpush1.bf16.msra.mxu1 %v3037_v28 }
 0x587   :  { %2504 = vmatprep.subr.bf16.mxu0 %v2970_v23  ;;  %2536 = vmatprep.subr.bf16.mxu1 %v3040_v29 }
 0x58a   :  { %2506 = vmatpush1.bf16.msra.mxu0 %v2976_v32  ;;  %2538 = vmatpush1.bf16.msra.mxu1 %v3045_v36 }
 0x58b   :  { %2508 = vmatprep.subr.bf16.mxu0 %v2979_v37  ;;  %2540 = vmatprep.subr.bf16.mxu1 %v3048_v38 }
 0x58e   :  { %2510 = vmatpush1.bf16.msra.mxu0 %v2982_v43  ;;  %2542 = vmatpush1.bf16.msra.mxu1 %v3053_v42 }
 0x58f   :  { %2544 = vmatprep.subr.bf16.mxu0 %v2922_v8  ;;  %2576 = vmatprep.subr.bf16.mxu1 %v2984_v45 }
 0x644   :  { %v1320_v34 = vpop.f32.mrb[10].mxu0  ;;  %v1391_v47 = vpop.f32.mrb[18].mxu1 }
 0x645   :  { %v1400_v48 = vrot.slane %v1320_v34, 6  ;;  %v1322_v41 = vpop.f32.mrb[11].mxu0  ;;  %v1393_v58 = vpop.f32.mrb[19].mxu1  ;;  %v1402_v8 = vrot.slane %v1391_v47, 6 }
 0x646   :  { %v1401_v51 = vrot.slane %v1322_v41, 6  ;;  %v1403_v9 = vrot.slane %v1393_v58, 6 }
 0x647   :  { %v1408_v56 = vadd.f32 %v1400_v48, %v3083_v62  ;;  %v1410_v45 = vadd.f32 %v1402_v8, %v3087_v24  ;;  %v1869_v8 = vld [vmem:[%s3437_s6 + $0x20] sm:$0xff] }
 0x648   :  { %v1409_v61 = vadd.f32 %v1401_v51, %v3085_v3  ;;  %v1411_v10 = vadd.f32 %v1403_v9, %v3091_v30  ;;  %v1865_v51 = vld [vmem:[%s3437_s6] sm:$0xff]  ;;  %v1868_v9 = vld [vmem:[%s3437_s6 + $0x18] sm:$0xff] }
 0x649   :  { %v1999_v14 = vmul.f32 -1.442695, %v1408_v56  ;;  %v1866_v56 = vld [vmem:[%s3437_s6 + $0x8] sm:$0xff] }
 0x64a   :  { %v2000_v5 = vmul.f32 -1.442695, %v1409_v61  ;;  %v2001_v1 = vmul.f32 -1.442695, %v1411_v10  ;;  %v1867_v61 = vld [vmem:[%s3437_s6 + $0x10] sm:$0xff] }
 0x64b   :  { %2719 = vpow2.f32 %v1999_v14  ;;  %v2846_v14 = vmov 0.0|0.0   ;;  %v2611_v10 = vpack.c.bf16 %v1868_v9, %v1867_v61 }
 0x64c   :  { %2721 = vpow2.f32 %v2000_v5  ;;  %v2608_v5 = vpack.c.bf16 %v1866_v56, %v1865_v51 }
 0x64d   :  { %2723 = vpow2.f32 %v2001_v1  ;;  %v1870_v1 = vld [vmem:[%s3437_s6 + $0x28] sm:$0xff] }
 0x64e   :  { %2725 = vtanh.f32 %v1410_v45  ;;  %v2614_v45 = vpack.c.bf16 %v1870_v1, %v1869_v8 }
 0x655   :  { %v2720_v22 = vpop.eup %2719 }
 0x656   :  { %v2722_v27 = vpop.eup %2721  ;;  %v1418_v33 = vadd.f32 1.0, %v2720_v22  ;;  %v1871_v22 = vld [vmem:[%s3437_s6 + $0x30] sm:$0xff] }
 0x657   :  { %v1419_v6 = vadd.f32 1.0, %v2722_v27  ;;  %v2724_v16 = vpop.eup %2723 }
 0x658   :  { %2727 = vrcp.f32 %v1418_v33  ;;  %v2726_v19 = vpop.eup %2725  ;;  %v1428_v40 = vadd.f32 1.0, %v2724_v16  ;;  %v1873_v33 = vld [vmem:[%s3437_s6 + $0x40] sm:$0xff] }
 0x659   :  { %2729 = vrcp.f32 %v1419_v6  ;;  %v1874_v6 = vld [vmem:[%s3437_s6 + $0x48] sm:$0xff] }
 0x65a   :  { %2731 = vrcp.f32 %v1428_v40  ;;  %v2620_v16 = vpack.c.bf16 %v1874_v6, %v1873_v33  ;;  %v2008_v6 = vld [vmem:[%s3435_s4] ss:$0 sm:$0xff]  ;;  %s2813_s4 = scalar_lea.vmem %s1971_s23, 32 }
 0x65b   :  { %p2814_p2 = scmp.ne.s32.totalorder %s1971_s23, %s2813_s4  ;;  %p2819_p4 = scmp.lt.s32.totalorder %s2813_s4, %s2813_s4 }
 0x65d   :  { %p2820_p5 = por %p2819_p4, %p2818_p3 }
 0x65f   :  { %p2821_p6 = pnand %p2820_p5, %p2814_p2 }
 0x662   :  { %v2728_v49 = vpop.eup %2727 }
 0x663   :  { %v2730_v25 = vpop.eup %2729  ;;  %v1435_v54 = vmul.f32 %v2728_v49, %v2726_v19  ;;  %v1875_v19 = vld [vmem:[%s3437_s6 + $0x50] sm:$0xff]  ;;  %v1876_v49 = vld [vmem:[%s3437_s6 + $0x58] sm:$0xff] }
 0x664   :  { %v1434_v46 = vmul.f32 %v2730_v25, %v1432_v55  ;;  %v2732_v34 = vpop.eup %2731  ;;  %v2623_v55 = vpack.c.bf16 %v1876_v49, %v1875_v19  ;;  %v1877_v25 = vld [vmem:[%s3437_s6 + $0x60] sm:$0xff] }
 0x665   :  { %v2009_v19 = vld [vmem:[%s3436_s5] ss:$0 sm:$0xff] }
 0x666   :  { %v3313_v15 = vadd.f32 %v1435_v54, %v1434_v46  ;;  %v1878_v54 = vld [vmem:[%s3437_s6 + $0x68] sm:$0xff]  ;;  %v1879_v46 = vld [vmem:[%s3437_s6 + $0x70] sm:$0xff] }
 0x667   :  { %v2626_v40 = vpack.c.bf16 %v1878_v54, %v1877_v25  ;;  %v2010_v54 = vld [vmem:[%s3438_s7] ss:$0 sm:$0xff] }
 0x668   :  { %2733 = vtanh.f32 %v3313_v15 }
 0x672   :  { %v2734_v47 = vpop.eup %2733 }
 0x673   :  { %v1438_v48 = vmul.f32 %v2734_v47, %v2732_v34 }
 0x675   :  { %v1440_v41 = vrot.slane %v1438_v48, 2 }
 0x677   :  { %1507 = vmatmul.mubr.f32.vlgmr.msra.gmra.mrb[12].mxu0 %v1440_v41  ;;  %1578 = vmatmul.mubr.f32.vlgmr.msra.gmra.mrb[20].mxu1 %v1440_v41 }
 0x678   :  { %2546 = vmatpush1.bf16.msra.mxu0 %v2924_v13  ;;  %2578 = vmatpush1.bf16.msra.mxu1 %v2987_v50 }
 0x679   :  { %2548 = vmatprep.subr.bf16.mxu0 %v2927_v18  ;;  %2580 = vmatprep.subr.bf16.mxu1 %v2993_v53 }
 0x67a   :  { %1694 = vmatprep.mubr.f32.mxu0 %v2845_v0  ;;  %1765 = vmatprep.mubr.f32.mxu1 %v2845_v0 }
 0x67c   :  { %2550 = vmatpush1.bf16.msra.mxu0 %v2931_v26  ;;  %2582 = vmatpush1.bf16.msra.mxu1 %v3000_v59 }
 0x67d   :  { %2552 = vmatprep.subr.bf16.mxu0 %v2933_v31  ;;  %2584 = vmatprep.subr.bf16.mxu1 %v3003_v60 }
 0x680   :  { %2554 = vmatpush1.bf16.msra.mxu0 %v2936_v39  ;;  %2586 = vmatpush1.bf16.msra.mxu1 %v3012_v63 }
 0x681   :  { %2556 = vmatprep.subr.bf16.mxu0 %v2939_v44  ;;  %2588 = vmatprep.subr.bf16.mxu1 %v3016_v4 }
 0x684   :  { %2558 = vmatpush1.bf16.msra.mxu0 %v2942_v52  ;;  %2590 = vmatpush1.bf16.msra.mxu1 %v3021_v11 }
 0x685   :  { %2560 = vmatprep.subr.bf16.mxu0 %v2945_v57  ;;  %2592 = vmatprep.subr.bf16.mxu1 %v3024_v12  ;;  %v1620_v12 = vrot.slane %v3313_v15, 6  ;;  %v1880_v15 = vld [vmem:[%s3437_s6 + $0x78] sm:$0xff] }
 0x686   :  { %v2629_v34 = vpack.c.bf16 %v1880_v15, %v1879_v46 }
 0x688   :  { %2562 = vmatpush1.bf16.msra.mxu0 %v2953_v2  ;;  %2594 = vmatpush1.bf16.msra.mxu1 %v3029_v20 }
 0x689   :  { %2564 = vmatprep.subr.bf16.mxu0 %v2956_v7  ;;  %2596 = vmatprep.subr.bf16.mxu1 %v3032_v21 }
 0x68c   :  { %2566 = vmatpush1.bf16.msra.mxu0 %v2967_v17  ;;  %2598 = vmatpush1.bf16.msra.mxu1 %v3037_v28 }
 0x68d   :  { %2568 = vmatprep.subr.bf16.mxu0 %v2970_v23  ;;  %2600 = vmatprep.subr.bf16.mxu1 %v3040_v29 }
 0x690   :  { %2570 = vmatpush1.bf16.msra.mxu0 %v2976_v32  ;;  %2602 = vmatpush1.bf16.msra.mxu1 %v3045_v36 }
 0x691   :  { %2572 = vmatprep.subr.bf16.mxu0 %v2979_v37  ;;  %2604 = vmatprep.subr.bf16.mxu1 %v3048_v38 }
 0x694   :  { %2574 = vmatpush1.bf16.msra.mxu0 %v2982_v43  ;;  %2606 = vmatpush1.bf16.msra.mxu1 %v3053_v42 }
 0x695   :  { %2607 = vmatprep.subr.bf16.mxu0 %v2846_v14 }
 0x74a   :  { %v1508_v13 = vpop.f32.mrb[12].mxu0  ;;  %v1579_v18 = vpop.f32.mrb[20].mxu1 }
 0x74b   :  { %v1588_v26 = vrot.slane %v1508_v13, 4  ;;  %v1510_v31 = vpop.f32.mrb[13].mxu0  ;;  %v1581_v39 = vpop.f32.mrb[21].mxu1  ;;  %v1590_v32 = vrot.slane %v1579_v18, 4 }
 0x74c   :  { %v1589_v44 = vrot.slane %v1510_v31, 4  ;;  %v1591_v17 = vrot.slane %v1581_v39, 4 }
 0x74d   :  { %v1596_v52 = vadd.f32 %v1588_v26, %v3083_v62  ;;  %v1598_v43 = vadd.f32 %v1590_v32, %v3087_v24 }
 0x74e   :  { %v1597_v57 = vadd.f32 %v1589_v44, %v3085_v3  ;;  %v1599_v23 = vadd.f32 %v1591_v17, %v3091_v30 }
 0x74f   :  { %v2002_v2 = vmul.f32 -1.442695, %v1596_v52 }
 0x750   :  { %v2003_v7 = vmul.f32 -1.442695, %v1597_v57  ;;  %v2004_v37 = vmul.f32 -1.442695, %v1599_v23 }
 0x751   :  { %2735 = vpow2.f32 %v2002_v2 }
 0x752   :  { %2737 = vpow2.f32 %v2003_v7 }
 0x753   :  { %2739 = vpow2.f32 %v2004_v37 }
 0x754   :  { %2741 = vtanh.f32 %v1598_v43 }
 0x75b   :  { %v2736_v50 = vpop.eup %2735 }
 0x75c   :  { %v2738_v53 = vpop.eup %2737  ;;  %v1606_v59 = vadd.f32 1.0, %v2736_v50 }
 0x75d   :  { %v1607_v60 = vadd.f32 1.0, %v2738_v53  ;;  %v2740_v63 = vpop.eup %2739 }
 0x75e   :  { %2743 = vrcp.f32 %v1606_v59  ;;  %v2742_v4 = vpop.eup %2741  ;;  %v1616_v28 = vadd.f32 1.0, %v2740_v63 }
 0x75f   :  { %2745 = vrcp.f32 %v1607_v60 }
 0x760   :  { %2747 = vrcp.f32 %v1616_v28 }
 0x768   :  { %v2744_v11 = vpop.eup %2743 }
 0x769   :  { %v2746_v20 = vpop.eup %2745  ;;  %v1623_v21 = vmul.f32 %v2744_v11, %v2742_v4 }
 0x76a   :  { %v1622_v29 = vmul.f32 %v2746_v20, %v1620_v12  ;;  %v2748_v38 = vpop.eup %2747 }
 0x76c   :  { %v3353_v36 = vadd.f32 %v1623_v21, %v1622_v29 }
 0x76e   :  { %2749 = vtanh.f32 %v3353_v36  ;;  %v1808_v59 = vrot.slane %v3353_v36, 6 }
 0x778   :  { %v2750_v42 = vpop.eup %2749 }
 0x779   :  { %v1626_v35 = vmul.f32 %v2750_v42, %v2748_v38 }
 0x77b   :  { %v1628_v58 = vrot.slane %v1626_v35, 4 }
 0x77d   :  { %1695 = vmatmul.mubr.f32.vlgmr.msra.gmra.mrb[14].mxu0 %v1628_v58  ;;  %1766 = vmatmul.mubr.f32.vlgmr.msra.gmra.mrb[22].mxu1 %v1628_v58 }
 0x77e   :  { %2060 = vmatprep.mubr.msk.f32.mxu0 %vm2847_vm1, %v2845_v0  ;;  %2609 = vmatpush3.bf16.msra.mxu0 %v2608_v5  ;;  %v1872_v0 = vld [vmem:[%s3437_s6 + $0x38] sm:$0xff] }
 0x77f   :  { %2610 = vmatprep.subr.bf16.mxu0 %v2846_v14  ;;  %v2617_v27 = vpack.c.bf16 %v1872_v0, %v1871_v22 }
 0x782   :  { %2612 = vmatpush3.bf16.msra.mxu0 %v2611_v10 }
 0x783   :  { %2613 = vmatprep.subr.bf16.mxu0 %v2846_v14 }
 0x786   :  { %2615 = vmatpush3.bf16.msra.mxu0 %v2614_v45 }
 0x787   :  { %2616 = vmatprep.subr.bf16.mxu0 %v2846_v14 }
 0x78a   :  { %2618 = vmatpush3.bf16.msra.mxu0 %v2617_v27 }
 0x78b   :  { %2619 = vmatprep.subr.bf16.mxu0 %v2846_v14 }
 0x78e   :  { %2621 = vmatpush3.bf16.msra.mxu0 %v2620_v16 }
 0x78f   :  { %2622 = vmatprep.subr.bf16.mxu0 %v2846_v14 }
 0x792   :  { %2624 = vmatpush3.bf16.msra.mxu0 %v2623_v55 }
 0x793   :  { %2625 = vmatprep.subr.bf16.mxu0 %v2846_v14 }
 0x796   :  { %2627 = vmatpush3.bf16.msra.mxu0 %v2626_v40 }
 0x797   :  { %2628 = vmatprep.subr.bf16.mxu0 %v2846_v14 }
 0x79a   :  { %2630 = vmatpush3.bf16.msra.mxu0 %v2629_v34 }
 0x850   :  { %v1696_v47 = vpop.f32.mrb[14].mxu0  ;;  %v1767_v48 = vpop.f32.mrb[22].mxu1 }
 0x851   :  { %v1776_v41 = vrot.slane %v1696_v47, 2  ;;  %v1698_v13 = vpop.f32.mrb[15].mxu0  ;;  %v1769_v18 = vpop.f32.mrb[23].mxu1  ;;  %v1778_v7 = vrot.slane %v1767_v48, 2 }
 0x852   :  { %v1777_v26 = vrot.slane %v1698_v13, 2  ;;  %v1779_v57 = vrot.slane %v1769_v18, 2 }
 0x853   :  { %v1784_v31 = vadd.f32 %v1776_v41, %v3083_v62  ;;  %v1786_v23 = vadd.f32 %v1778_v7, %v3087_v24 }
 0x854   :  { %v1785_v39 = vadd.f32 %v1777_v26, %v3085_v3  ;;  %v1787_v2 = vadd.f32 %v1779_v57, %v3091_v30 }
 0x855   :  { %v2005_v44 = vmul.f32 -1.442695, %v1784_v31 }
 0x856   :  { %v2006_v52 = vmul.f32 -1.442695, %v1785_v39  ;;  %v2007_v17 = vmul.f32 -1.442695, %v1787_v2 }
 0x857   :  { %2751 = vpow2.f32 %v2005_v44 }
 0x858   :  { %2753 = vpow2.f32 %v2006_v52 }
 0x859   :  { %2755 = vpow2.f32 %v2007_v17 }
 0x85a   :  { %2757 = vtanh.f32 %v1786_v23 }
 0x861   :  { %v2752_v32 = vpop.eup %2751 }
 0x862   :  { %v2754_v37 = vpop.eup %2753  ;;  %v1794_v43 = vadd.f32 1.0, %v2752_v32 }
 0x863   :  { %v1795_v50 = vadd.f32 1.0, %v2754_v37  ;;  %v2756_v62 = vpop.eup %2755 }
 0x864   :  { %2759 = vrcp.f32 %v1794_v43  ;;  %v2758_v3 = vpop.eup %2757  ;;  %v1804_v30 = vadd.f32 1.0, %v2756_v62 }
 0x865   :  { %2761 = vrcp.f32 %v1795_v50 }
 0x866   :  { %2763 = vrcp.f32 %v1804_v30 }
 0x86e   :  { %v2760_v53 = vpop.eup %2759 }
 0x86f   :  { %v2762_v60 = vpop.eup %2761  ;;  %v1811_v63 = vmul.f32 %v2760_v53, %v2758_v3 }
 0x870   :  { %v1810_v4 = vmul.f32 %v2762_v60, %v1808_v59  ;;  %v2764_v24 = vpop.eup %2763 }
 0x872   :  { %v1812_v11 = vadd.f32 %v1811_v63, %v1810_v4 }
 0x874   :  { %2765 = vtanh.f32 %v1812_v11  ;;  %1816 = vst [vmem:[#allocation3 - $0x6] sm:$0xc0] %v1812_v11 }
 0x87e   :  { %v2766_v12 = vpop.eup %2765 }
 0x87f   :  { %v1814_v20 = vmul.f32 %v2766_v12, %v2764_v24 }
 0x881   :  { %1815 = vst [vmem:[#allocation2 - $0x6] sm:$0xc0] %v1814_v20  ;;  %v1821_v21 = vrot.slane %v1814_v20, 6 }
 0x883   :  { %v1824_v28 = vsel %vm1823_vm2, %v1821_v21, 0.0 }
 0x884   :  { %v1825_v29 = vrot.slane %v1824_v28, 4 }
 0x886   :  { %v1826_v38 = vadd.f32 %v1825_v29, %v1824_v28 }
 0x888   :  { %v1827_v42 = vrot.slane %v1826_v38, 2 }
 0x88a   :  { %v1828_v35 = vadd.f32 %v1827_v42, %v1826_v38 }
 0x88c   :  { %v1829_v36 = vrot.slane %v1828_v35, 1 }
 0x88e   :  { %v1830_v58 = vadd.f32 %v1829_v36, %v1828_v35 }
 0x890   :  { %v1832_v51 = vmul.f32 0.5, %v1830_v58 }
 0x892   :  { %v1833_v56 = vsub.f32 %v1814_v20, %v1832_v51 }
 0x894   :  { %v1834_v61 = vmul.f32 %v1833_v56, %v1833_v56 }
 0x896   :  { %v1836_v14 = vrot.slane %v1834_v61, 6 }
 0x898   :  { %v1838_v5 = vsel %vm1823_vm2, %v1836_v14, 0.0 }
 0x899   :  { %v1839_v9 = vrot.slane %v1838_v5, 4 }
 0x89b   :  { %v1840_v10 = vadd.f32 %v1839_v9, %v1838_v5 }
 0x89d   :  { %v1841_v8 = vrot.slane %v1840_v10, 2 }
 0x89f   :  { %v1842_v1 = vadd.f32 %v1841_v8, %v1840_v10 }
 0x8a1   :  { %v1843_v45 = vrot.slane %v1842_v1, 1 }
 0x8a3   :  { %v1844_v22 = vadd.f32 %v1843_v45, %v1842_v1 }
 0x8a5   :  { %v1845_v0 = vmul.f32 0.5, %v1844_v22 }
 0x8a7   :  { %v1846_v27 = vadd.f32 1e-05, %v1845_v0 }
 0x8a9   :  { %2767 = vrsqrt.f32 %v1846_v27 }
 0x8b3   :  { %v2768_v33 = vpop.eup %2767 }
 0x8b4   :  { %v1848_v16 = vmul.f32 %v2768_v33, %v1833_v56 }
 0x8b6   :  { %v1856_v49 = vmul.f32 %v2008_v6, %v1848_v16 }
 0x8b8   :  { %v1864_v55 = vadd.f32 %v2009_v19, %v1856_v49 }
 0x8ba   :  { %v1889_v25 = vrot.slane %v1864_v55, 6 }
 0x8bc   :  { %2061 = vmatmul.mubr.f32.vlgmr.msra.gmra.mrb[16].mxu0 %v1889_v25 }
 0x98f   :  { %v1957_v40 = vpop.f32.mrb[16].mxu0 }
 0x990   :  { %v1958_v46 = vadd.f32 %v2010_v54, %v1957_v40  ;;  %v2062_v15 = vpop.f32.mrb[17].mxu0 }
 0x992   :  { %v1961_v34 = vmax.f32 %v1958_v46, 0.0 }
 0x994   :  { %1963 = vst.msk [vmem:[#allocation9] sm:$0x3] %vm1962_vm3, %v1961_v34 }
 0x995   :  { %2824 = shalt.err (!%p2821_p6)
}
 0x996   :  { %s2825_s7 = scalar_lea.hbm %s3439_s8, 32 }
 0x997   :  { %p2826_p7 = scmp.ne.s32.totalorder %s3439_s8, %s2825_s7  ;;  %p2829_p8 = scmp.lt.u32.totalorder %s2825_s7, %s3439_s8 }
 0x999   :  { %p2831_p9 = pnand %p2829_p8, %p2826_p7 }
 0x99b   :  { %2834 = shalt.err (!%p2831_p9)
}
 0x99c   :  { %1973 = dma.vmem_to_hbm [thread:$0]  %s1971_s23, 32, %s3439_s8, [#allocation6]  }
 0x99d   :  { %2839 = dma.done.wait [#allocation6], 32  }
 0x99e   :  { %2840 = vsyncadd [#allocation6], 4294967264 }
 0x99f   :  { %1977 = vsyncpa [#allocation5], 1 }
 0x9a0   :  { %1978 = vsyncpa [#allocation8], 1 }
 0x9a1   :  { %1979 = vsyncpa [#allocation6], 1 }

</bundles_post_ra>
